<compile_context>
chip_gen: v5e
topology: v5e:2x2
jax: 0.10.0
libtpu: 0.0.40
codegen_flags: <defaults>
</compile_context>

<pallas_src>
import functools

import jax
import jax.numpy as jnp
from jax.experimental import pallas as pl
from jax.experimental.pallas import tpu as pltpu

# (h % 3, w % 3) -> torch.roll shift (before the inv multiplier is applied).
_SHIFT_TABLE = {
    (0, 0): -4, (0, 1): 1, (0, 2): 2,
    (1, 0): -1, (1, 1): 0, (1, 2): 3,
    (2, 0): -2, (2, 1): -3, (2, 2): 4,
}


def _shift_groups(T, multiplier):
    """Group shift classes by their source-time offset delta = (-s*mult) % T.

    Classes with delta == 0 are the identity group (no select needed).
    Returns a tuple of (delta, class_ids) for delta != 0, deterministic order.
    """
    by_delta = {}
    for (hm, wm), s in _SHIFT_TABLE.items():
        delta = (-s * multiplier) % T
        by_delta.setdefault(delta, []).append(3 * hm + wm)
    return tuple((d, tuple(sorted(ids)))
                 for d, ids in sorted(by_delta.items()) if d != 0)


def _patch_shift_kernel(cls_ref, x_ref, o_ref, *, t_block, groups):
    """Grid step (n, tb): produce t_block output time slices for one feature tile.

    cls_ref: (n1_blk, N2) int32      per-lane shift-class id: 3*(h%3) + (w%3)
    x_ref:   (B, T, n1_blk, N2)      full-T input tile (resident across inner t axis)
    o_ref:   (B, t_block, n1_blk, N2)
    groups:  static tuple of (delta, class_ids) with delta != 0
    """
    T = x_ref.shape[1]
    tb = pl.program_id(1)
    cls = cls_ref[...]

    # Hoisted, t-independent lane masks (one per merged nonzero time offset).
    group_masks = []
    for delta, ids in groups:
        m = cls == ids[0]
        for k in ids[1:]:
            m = jnp.logical_or(m, cls == k)
        group_masks.append((delta, m))

    for to in range(t_block):
        t = tb * t_block + to
        out = x_ref[:, t]                       # identity (delta == 0) lanes
        for delta, mask in group_masks:
            src = (t + delta) % T               # source time slice for this group
            out = jnp.where(mask, x_ref[:, src], out)
        o_ref[:, to] = out


def _pick_feature_block(n1, row_bytes, budget_bytes):
    """Largest multiple-of-8 divisor of n1 whose working set fits the budget."""
    if n1 % 8 != 0:
        return n1
    cands = [d for d in range(8, n1 + 1, 8) if n1 % d == 0]
    fitting = [d for d in cands if d * row_bytes <= budget_bytes]
    return max(fitting) if fitting else min(cands)


def patch_shift(x, inv=False):
    """Pallas TPU implementation of PatchShift.shift(x, inv). x: (B, T, H, W, C)."""
    B, T, H, W, C = x.shape
    multiplier = -1 if inv else 1
    N = H * W * C
    itemsize = jnp.dtype(x.dtype).itemsize

    # Lane-dense flattened feature layout (B, T, N1, N2).
    if N % 128 == 0:
        N2 = 128
        N1 = N // 128
    else:
        # Generic fallback: one (1, N) row per (b, t). Correct; lanes padded.
        N2 = N
        N1 = 1

    # Static per-lane shift-class ids (no vector integer div/mod in the kernel).
    hmod = jnp.arange(H, dtype=jnp.int32) % 3
    wmod = jnp.arange(W, dtype=jnp.int32) % 3
    cls_hw = 3 * hmod[:, None] + wmod[None, :]                      # (H, W)
    cls = jnp.broadcast_to(cls_hw[:, :, None], (H, W, C)).reshape(N1, N2)
    cls = cls.astype(jnp.int32)

    # Merge shift classes whose roll offsets coincide modulo T (fewer selects).
    groups = _shift_groups(T, multiplier)

    # Time block: several slices per grid step amortize per-step overhead.
    t_blk = max(d for d in range(1, T + 1) if T % d == 0 and d <= 8)

    # Feature block: bound the double-buffered working set (smallest per-core
    # VMEM target is v7x: 64 MiB/TC, 32 MiB scoped default).
    budget = 24 * 1024 * 1024
    row_bytes = 2 * (B * T * N2 * itemsize        # resident input (double buffered)
                     + B * t_blk * N2 * itemsize  # output block
                     + N2 * 4)                    # class-id block
    n1_blk = N1
    if N1 * row_bytes > budget:
        n1_blk = _pick_feature_block(N1, row_bytes, budget)

    vmem_limit = int(max(n1_blk * row_bytes + (4 << 20), 32 << 20))

    x_flat = x.reshape(B, T, N1, N2)
    kernel = functools.partial(_patch_shift_kernel, t_block=t_blk, groups=groups)

    out_flat = pl.pallas_call(
        kernel,
        out_shape=jax.ShapeDtypeStruct((B, T, N1, N2), x.dtype),
        grid_spec=pltpu.PrefetchScalarGridSpec(
            num_scalar_prefetch=0,
            grid=(N1 // n1_blk, T // t_blk),      # feature axis outermost, T innermost
            in_specs=[
                pl.BlockSpec((n1_blk, N2), lambda n, t: (n, 0)),
                # Block index independent of t -> full-T tile stays resident in VMEM.
                pl.BlockSpec((B, T, n1_blk, N2), lambda n, t: (0, 0, n, 0)),
            ],
            out_specs=pl.BlockSpec((B, t_blk, n1_blk, N2),
                                   lambda n, t: (0, t, n, 0)),
        ),
        compiler_params=pltpu.CompilerParams(
            dimension_semantics=("parallel", "arbitrary"),
            vmem_limit_bytes=vmem_limit,
        ),
        cost_estimate=pl.CostEstimate(
            flops=0,
            transcendentals=0,
            bytes_accessed=2 * B * T * N * itemsize + N1 * N2 * 4,
        ),
    )(cls, x_flat)

    return out_flat.reshape(B, T, H, W, C)


def patch_shift_ref(x, inv=False):
    """Pure-JAX reference mirroring the PyTorch slicing exactly."""
    mult = -1 if inv else 1
    out = x
    out = out.at[:, :, 0::3, 0::3, :].set(
        jnp.roll(x[:, :, 0::3, 0::3, :], -4 * mult, axis=1))
    out = out.at[:, :, 0::3, 1::3, :].set(
        jnp.roll(x[:, :, 0::3, 1::3, :], 1 * mult, axis=1))
    out = out.at[:, :, 1::3, 0::3, :].set(
        jnp.roll(x[:, :, 1::3, 0::3, :], -1 * mult, axis=1))
    out = out.at[:, :, 0::3, 2::3, :].set(
        jnp.roll(x[:, :, 0::3, 2::3, :], 2 * mult, axis=1))
    out = out.at[:, :, 2::3, 0::3, :].set(
        jnp.roll(x[:, :, 2::3, 0::3, :], -2 * mult, axis=1))
    out = out.at[:, :, 1::3, 2::3, :].set(
        jnp.roll(x[:, :, 1::3, 2::3, :], 3 * mult, axis=1))
    out = out.at[:, :, 2::3, 1::3, :].set(
        jnp.roll(x[:, :, 2::3, 1::3, :], -3 * mult, axis=1))
    out = out.at[:, :, 2::3, 2::3, :].set(
        jnp.roll(x[:, :, 2::3, 2::3, :], 4 * mult, axis=1))
    return out


if __name__ == "__main__":
    k1, k2 = jax.random.split(jax.random.PRNGKey(0))
    ok = True

    # Primary shape: lane-dense fast path (H*W*C = 1152 is a multiple of 128).
    x = jax.random.normal(k1, (2, 8, 6, 6, 32), dtype=jnp.float32)
    for inv in (False, True):
        out = jax.block_until_ready(patch_shift(x, inv=inv))
        ok = ok and bool(jnp.array_equal(out, patch_shift_ref(x, inv=inv)))

    # bf16 input on the same shape (pure data movement -> exact match).
    xb = x.astype(jnp.bfloat16)
    outb = jax.block_until_ready(patch_shift(xb, inv=False))
    ok = ok and bool(jnp.array_equal(outb, patch_shift_ref(xb, inv=False)))

    # Odd shape (H, W not multiples of 3; H*W*C not a multiple of 128; T=4 so
    # several roll offsets coincide mod T): exercises the generic fallback
    # layout and the shift-class merging path.
    x2 = jax.random.normal(k2, (1, 4, 5, 7, 16), dtype=jnp.float32)
    for inv in (False, True):
        out2 = jax.block_until_ready(patch_shift(x2, inv=inv))
        ok = ok and bool(jnp.array_equal(out2, patch_shift_ref(x2, inv=inv)))

    print("KERNEL_OK" if ok else "KERNEL_MISMATCH")
</pallas_src>

<mosaic_0001>
module attributes {stable_mosaic.version = 11 : i64} {
  func.func @_patch_shift_kernel(%arg0: i32, %arg1: i32, %arg2: memref<9x128xi32, #tpu.memory_space<vmem>>, %arg3: memref<2x8x9x128xf32, #tpu.memory_space<vmem>>, %arg4: memref<2x8x9x128xf32, #tpu.memory_space<vmem>>) attributes {dimension_semantics = [#tpu.dimension_semantics<parallel>, #tpu.dimension_semantics<arbitrary>], iteration_bounds = array<i64: 1, 1>, scalar_prefetch = 0 : i64, scratch_operands = 0 : i64, tpu.core_type = #tpu.core_type<tc>, window_params = [{transform_indices = @transform_0, window_bounds = array<i64: 9, 128>}, {transform_indices = @transform_1, window_bounds = array<i64: 2, 8, 9, 128>}, {transform_indices = @transform_2, window_bounds = array<i64: 2, 8, 9, 128>}]} {
    %c0 = arith.constant 0 : index
    %c0_0 = arith.constant 0 : index
    %0 = vector.load %arg2[%c0, %c0_0] : memref<9x128xi32, #tpu.memory_space<vmem>>, vector<9x128xi32>
    %c3_i32 = arith.constant 3 : i32
    %1 = vector.broadcast %c3_i32 : i32 to vector<9x128xi32>
    %2 = arith.cmpi eq, %0, %1 : vector<9x128xi32>
    %c6_i32 = arith.constant 6 : i32
    %3 = vector.broadcast %c6_i32 : i32 to vector<9x128xi32>
    %4 = arith.cmpi eq, %0, %3 : vector<9x128xi32>
    %c7_i32 = arith.constant 7 : i32
    %5 = vector.broadcast %c7_i32 : i32 to vector<9x128xi32>
    %6 = arith.cmpi eq, %0, %5 : vector<9x128xi32>
    %c0_i32 = arith.constant 0 : i32
    %7 = vector.broadcast %c0_i32 : i32 to vector<9x128xi32>
    %8 = arith.cmpi eq, %0, %7 : vector<9x128xi32>
    %c8_i32 = arith.constant 8 : i32
    %9 = vector.broadcast %c8_i32 : i32 to vector<9x128xi32>
    %10 = arith.cmpi eq, %0, %9 : vector<9x128xi32>
    %11 = arith.ori %8, %10 : vector<9x128xi1>
    %c5_i32 = arith.constant 5 : i32
    %12 = vector.broadcast %c5_i32 : i32 to vector<9x128xi32>
    %13 = arith.cmpi eq, %0, %12 : vector<9x128xi32>
    %c2_i32 = arith.constant 2 : i32
    %14 = vector.broadcast %c2_i32 : i32 to vector<9x128xi32>
    %15 = arith.cmpi eq, %0, %14 : vector<9x128xi32>
    %c1_i32 = arith.constant 1 : i32
    %16 = vector.broadcast %c1_i32 : i32 to vector<9x128xi32>
    %17 = arith.cmpi eq, %0, %16 : vector<9x128xi32>
    %c8_i32_1 = arith.constant 8 : i32
    %18 = arith.muli %arg1, %c8_i32_1 : i32
    %c0_i32_2 = arith.constant 0 : i32
    %19 = arith.addi %18, %c0_i32_2 : i32
    %c0_3 = arith.constant 0 : index
    %20 = arith.index_cast %19 : i32 to index
    %c0_4 = arith.constant 0 : index
    %c0_5 = arith.constant 0 : index
    %21 = vector.load %arg3[%c0_3, %20, %c0_4, %c0_5] : memref<2x8x9x128xf32, #tpu.memory_space<vmem>>, vector<2x1x9x128xf32>
    %22 = vector.shape_cast %21 : vector<2x1x9x128xf32> to vector<2x9x128xf32>
    %c1_i32_6 = arith.constant 1 : i32
    %23 = arith.addi %19, %c1_i32_6 : i32
    %c8_i32_7 = arith.constant 8 : i32
    %c0_i32_8 = arith.constant 0 : i32
    %24 = arith.cmpi eq, %c8_i32_7, %c0_i32_8 : i32
    %c1_i32_9 = arith.constant 1 : i32
    %25 = arith.select %24, %c1_i32_9, %c8_i32_7 : i32
    %26 = arith.remsi %23, %25 : i32
    %c0_i32_10 = arith.constant 0 : i32
    %27 = arith.cmpi ne, %26, %c0_i32_10 : i32
    %c0_i32_11 = arith.constant 0 : i32
    %28 = arith.cmpi slt, %26, %c0_i32_11 : i32
    %c0_i32_12 = arith.constant 0 : i32
    %29 = arith.cmpi slt, %25, %c0_i32_12 : i32
    %30 = arith.xori %28, %29 : i1
    %31 = arith.andi %30, %27 : i1
    %32 = arith.addi %26, %25 : i32
    %33 = arith.select %31, %32, %26 : i32
    %c0_13 = arith.constant 0 : index
    %34 = arith.index_cast %33 : i32 to index
    %c0_14 = arith.constant 0 : index
    %c0_15 = arith.constant 0 : index
    %35 = vector.load %arg3[%c0_13, %34, %c0_14, %c0_15] : memref<2x8x9x128xf32, #tpu.memory_space<vmem>>, vector<2x1x9x128xf32>
    %36 = vector.shape_cast %35 : vector<2x1x9x128xf32> to vector<2x9x128xf32>
    %37 = vector.shape_cast %2 : vector<9x128xi1> to vector<1x9x128xi1>
    %38 = vector.broadcast %37 : vector<1x9x128xi1> to vector<2x9x128xi1>
    %39 = arith.select %38, %36, %22 : vector<2x9x128xi1>, vector<2x9x128xf32>
    %c2_i32_16 = arith.constant 2 : i32
    %40 = arith.addi %19, %c2_i32_16 : i32
    %c8_i32_17 = arith.constant 8 : i32
    %c0_i32_18 = arith.constant 0 : i32
    %41 = arith.cmpi eq, %c8_i32_17, %c0_i32_18 : i32
    %c1_i32_19 = arith.constant 1 : i32
    %42 = arith.select %41, %c1_i32_19, %c8_i32_17 : i32
    %43 = arith.remsi %40, %42 : i32
    %c0_i32_20 = arith.constant 0 : i32
    %44 = arith.cmpi ne, %43, %c0_i32_20 : i32
    %c0_i32_21 = arith.constant 0 : i32
    %45 = arith.cmpi slt, %43, %c0_i32_21 : i32
    %c0_i32_22 = arith.constant 0 : i32
    %46 = arith.cmpi slt, %42, %c0_i32_22 : i32
    %47 = arith.xori %45, %46 : i1
    %48 = arith.andi %47, %44 : i1
    %49 = arith.addi %43, %42 : i32
    %50 = arith.select %48, %49, %43 : i32
    %c0_23 = arith.constant 0 : index
    %51 = arith.index_cast %50 : i32 to index
    %c0_24 = arith.constant 0 : index
    %c0_25 = arith.constant 0 : index
    %52 = vector.load %arg3[%c0_23, %51, %c0_24, %c0_25] : memref<2x8x9x128xf32, #tpu.memory_space<vmem>>, vector<2x1x9x128xf32>
    %53 = vector.shape_cast %52 : vector<2x1x9x128xf32> to vector<2x9x128xf32>
    %54 = vector.shape_cast %4 : vector<9x128xi1> to vector<1x9x128xi1>
    %55 = vector.broadcast %54 : vector<1x9x128xi1> to vector<2x9x128xi1>
    %56 = arith.select %55, %53, %39 : vector<2x9x128xi1>, vector<2x9x128xf32>
    %c3_i32_26 = arith.constant 3 : i32
    %57 = arith.addi %19, %c3_i32_26 : i32
    %c8_i32_27 = arith.constant 8 : i32
    %c0_i32_28 = arith.constant 0 : i32
    %58 = arith.cmpi eq, %c8_i32_27, %c0_i32_28 : i32
    %c1_i32_29 = arith.constant 1 : i32
    %59 = arith.select %58, %c1_i32_29, %c8_i32_27 : i32
    %60 = arith.remsi %57, %59 : i32
    %c0_i32_30 = arith.constant 0 : i32
    %61 = arith.cmpi ne, %60, %c0_i32_30 : i32
    %c0_i32_31 = arith.constant 0 : i32
    %62 = arith.cmpi slt, %60, %c0_i32_31 : i32
    %c0_i32_32 = arith.constant 0 : i32
    %63 = arith.cmpi slt, %59, %c0_i32_32 : i32
    %64 = arith.xori %62, %63 : i1
    %65 = arith.andi %64, %61 : i1
    %66 = arith.addi %60, %59 : i32
    %67 = arith.select %65, %66, %60 : i32
    %c0_33 = arith.constant 0 : index
    %68 = arith.index_cast %67 : i32 to index
    %c0_34 = arith.constant 0 : index
    %c0_35 = arith.constant 0 : index
    %69 = vector.load %arg3[%c0_33, %68, %c0_34, %c0_35] : memref<2x8x9x128xf32, #tpu.memory_space<vmem>>, vector<2x1x9x128xf32>
    %70 = vector.shape_cast %69 : vector<2x1x9x128xf32> to vector<2x9x128xf32>
    %71 = vector.shape_cast %6 : vector<9x128xi1> to vector<1x9x128xi1>
    %72 = vector.broadcast %71 : vector<1x9x128xi1> to vector<2x9x128xi1>
    %73 = arith.select %72, %70, %56 : vector<2x9x128xi1>, vector<2x9x128xf32>
    %c4_i32 = arith.constant 4 : i32
    %74 = arith.addi %19, %c4_i32 : i32
    %c8_i32_36 = arith.constant 8 : i32
    %c0_i32_37 = arith.constant 0 : i32
    %75 = arith.cmpi eq, %c8_i32_36, %c0_i32_37 : i32
    %c1_i32_38 = arith.constant 1 : i32
    %76 = arith.select %75, %c1_i32_38, %c8_i32_36 : i32
    %77 = arith.remsi %74, %76 : i32
    %c0_i32_39 = arith.constant 0 : i32
    %78 = arith.cmpi ne, %77, %c0_i32_39 : i32
    %c0_i32_40 = arith.constant 0 : i32
    %79 = arith.cmpi slt, %77, %c0_i32_40 : i32
    %c0_i32_41 = arith.constant 0 : i32
    %80 = arith.cmpi slt, %76, %c0_i32_41 : i32
    %81 = arith.xori %79, %80 : i1
    %82 = arith.andi %81, %78 : i1
    %83 = arith.addi %77, %76 : i32
    %84 = arith.select %82, %83, %77 : i32
    %c0_42 = arith.constant 0 : index
    %85 = arith.index_cast %84 : i32 to index
    %c0_43 = arith.constant 0 : index
    %c0_44 = arith.constant 0 : index
    %86 = vector.load %arg3[%c0_42, %85, %c0_43, %c0_44] : memref<2x8x9x128xf32, #tpu.memory_space<vmem>>, vector<2x1x9x128xf32>
    %87 = vector.shape_cast %86 : vector<2x1x9x128xf32> to vector<2x9x128xf32>
    %88 = vector.shape_cast %11 : vector<9x128xi1> to vector<1x9x128xi1>
    %89 = vector.broadcast %88 : vector<1x9x128xi1> to vector<2x9x128xi1>
    %90 = arith.select %89, %87, %73 : vector<2x9x128xi1>, vector<2x9x128xf32>
    %c5_i32_45 = arith.constant 5 : i32
    %91 = arith.addi %19, %c5_i32_45 : i32
    %c8_i32_46 = arith.constant 8 : i32
    %c0_i32_47 = arith.constant 0 : i32
    %92 = arith.cmpi eq, %c8_i32_46, %c0_i32_47 : i32
    %c1_i32_48 = arith.constant 1 : i32
    %93 = arith.select %92, %c1_i32_48, %c8_i32_46 : i32
    %94 = arith.remsi %91, %93 : i32
    %c0_i32_49 = arith.constant 0 : i32
    %95 = arith.cmpi ne, %94, %c0_i32_49 : i32
    %c0_i32_50 = arith.constant 0 : i32
    %96 = arith.cmpi slt, %94, %c0_i32_50 : i32
    %c0_i32_51 = arith.constant 0 : i32
    %97 = arith.cmpi slt, %93, %c0_i32_51 : i32
    %98 = arith.xori %96, %97 : i1
    %99 = arith.andi %98, %95 : i1
    %100 = arith.addi %94, %93 : i32
    %101 = arith.select %99, %100, %94 : i32
    %c0_52 = arith.constant 0 : index
    %102 = arith.index_cast %101 : i32 to index
    %c0_53 = arith.constant 0 : index
    %c0_54 = arith.constant 0 : index
    %103 = vector.load %arg3[%c0_52, %102, %c0_53, %c0_54] : memref<2x8x9x128xf32, #tpu.memory_space<vmem>>, vector<2x1x9x128xf32>
    %104 = vector.shape_cast %103 : vector<2x1x9x128xf32> to vector<2x9x128xf32>
    %105 = vector.shape_cast %13 : vector<9x128xi1> to vector<1x9x128xi1>
    %106 = vector.broadcast %105 : vector<1x9x128xi1> to vector<2x9x128xi1>
    %107 = arith.select %106, %104, %90 : vector<2x9x128xi1>, vector<2x9x128xf32>
    %c6_i32_55 = arith.constant 6 : i32
    %108 = arith.addi %19, %c6_i32_55 : i32
    %c8_i32_56 = arith.constant 8 : i32
    %c0_i32_57 = arith.constant 0 : i32
    %109 = arith.cmpi eq, %c8_i32_56, %c0_i32_57 : i32
    %c1_i32_58 = arith.constant 1 : i32
    %110 = arith.select %109, %c1_i32_58, %c8_i32_56 : i32
    %111 = arith.remsi %108, %110 : i32
    %c0_i32_59 = arith.constant 0 : i32
    %112 = arith.cmpi ne, %111, %c0_i32_59 : i32
    %c0_i32_60 = arith.constant 0 : i32
    %113 = arith.cmpi slt, %111, %c0_i32_60 : i32
    %c0_i32_61 = arith.constant 0 : i32
    %114 = arith.cmpi slt, %110, %c0_i32_61 : i32
    %115 = arith.xori %113, %114 : i1
    %116 = arith.andi %115, %112 : i1
    %117 = arith.addi %111, %110 : i32
    %118 = arith.select %116, %117, %111 : i32
    %c0_62 = arith.constant 0 : index
    %119 = arith.index_cast %118 : i32 to index
    %c0_63 = arith.constant 0 : index
    %c0_64 = arith.constant 0 : index
    %120 = vector.load %arg3[%c0_62, %119, %c0_63, %c0_64] : memref<2x8x9x128xf32, #tpu.memory_space<vmem>>, vector<2x1x9x128xf32>
    %121 = vector.shape_cast %120 : vector<2x1x9x128xf32> to vector<2x9x128xf32>
    %122 = vector.shape_cast %15 : vector<9x128xi1> to vector<1x9x128xi1>
    %123 = vector.broadcast %122 : vector<1x9x128xi1> to vector<2x9x128xi1>
    %124 = arith.select %123, %121, %107 : vector<2x9x128xi1>, vector<2x9x128xf32>
    %c7_i32_65 = arith.constant 7 : i32
    %125 = arith.addi %19, %c7_i32_65 : i32
    %c8_i32_66 = arith.constant 8 : i32
    %c0_i32_67 = arith.constant 0 : i32
    %126 = arith.cmpi eq, %c8_i32_66, %c0_i32_67 : i32
    %c1_i32_68 = arith.constant 1 : i32
    %127 = arith.select %126, %c1_i32_68, %c8_i32_66 : i32
    %128 = arith.remsi %125, %127 : i32
    %c0_i32_69 = arith.constant 0 : i32
    %129 = arith.cmpi ne, %128, %c0_i32_69 : i32
    %c0_i32_70 = arith.constant 0 : i32
    %130 = arith.cmpi slt, %128, %c0_i32_70 : i32
    %c0_i32_71 = arith.constant 0 : i32
    %131 = arith.cmpi slt, %127, %c0_i32_71 : i32
    %132 = arith.xori %130, %131 : i1
    %133 = arith.andi %132, %129 : i1
    %134 = arith.addi %128, %127 : i32
    %135 = arith.select %133, %134, %128 : i32
    %c0_72 = arith.constant 0 : index
    %136 = arith.index_cast %135 : i32 to index
    %c0_73 = arith.constant 0 : index
    %c0_74 = arith.constant 0 : index
    %137 = vector.load %arg3[%c0_72, %136, %c0_73, %c0_74] : memref<2x8x9x128xf32, #tpu.memory_space<vmem>>, vector<2x1x9x128xf32>
    %138 = vector.shape_cast %137 : vector<2x1x9x128xf32> to vector<2x9x128xf32>
    %139 = vector.shape_cast %17 : vector<9x128xi1> to vector<1x9x128xi1>
    %140 = vector.broadcast %139 : vector<1x9x128xi1> to vector<2x9x128xi1>
    %141 = arith.select %140, %138, %124 : vector<2x9x128xi1>, vector<2x9x128xf32>
    %c0_75 = arith.constant 0 : index
    %c0_76 = arith.constant 0 : index
    %c0_77 = arith.constant 0 : index
    %c0_78 = arith.constant 0 : index
    %142 = vector.load %arg4[%c0_75, %c0_76, %c0_77, %c0_78] : memref<2x8x9x128xf32, #tpu.memory_space<vmem>>, vector<2x1x9x128xf32>
    %143 = vector.shape_cast %142 : vector<2x1x9x128xf32> to vector<2x9x128xf32>
    %144 = vector.shape_cast %141 : vector<2x9x128xf32> to vector<2x1x9x128xf32>
    tpu.vector_store %arg4[%c0_75, %c0_76, %c0_77, %c0_78], %144 {strides = array<i32>} : memref<2x8x9x128xf32, #tpu.memory_space<vmem>>, vector<2x1x9x128xf32>,
    %c8_i32_79 = arith.constant 8 : i32
    %145 = arith.muli %arg1, %c8_i32_79 : i32
    %c1_i32_80 = arith.constant 1 : i32
    %146 = arith.addi %145, %c1_i32_80 : i32
    %c0_81 = arith.constant 0 : index
    %147 = arith.index_cast %146 : i32 to index
    %c0_82 = arith.constant 0 : index
    %c0_83 = arith.constant 0 : index
    %148 = vector.load %arg3[%c0_81, %147, %c0_82, %c0_83] : memref<2x8x9x128xf32, #tpu.memory_space<vmem>>, vector<2x1x9x128xf32>
    %149 = vector.shape_cast %148 : vector<2x1x9x128xf32> to vector<2x9x128xf32>
    %c1_i32_84 = arith.constant 1 : i32
    %150 = arith.addi %146, %c1_i32_84 : i32
    %c8_i32_85 = arith.constant 8 : i32
    %c0_i32_86 = arith.constant 0 : i32
    %151 = arith.cmpi eq, %c8_i32_85, %c0_i32_86 : i32
    %c1_i32_87 = arith.constant 1 : i32
    %152 = arith.select %151, %c1_i32_87, %c8_i32_85 : i32
    %153 = arith.remsi %150, %152 : i32
    %c0_i32_88 = arith.constant 0 : i32
    %154 = arith.cmpi ne, %153, %c0_i32_88 : i32
    %c0_i32_89 = arith.constant 0 : i32
    %155 = arith.cmpi slt, %153, %c0_i32_89 : i32
    %c0_i32_90 = arith.constant 0 : i32
    %156 = arith.cmpi slt, %152, %c0_i32_90 : i32
    %157 = arith.xori %155, %156 : i1
    %158 = arith.andi %157, %154 : i1
    %159 = arith.addi %153, %152 : i32
    %160 = arith.select %158, %159, %153 : i32
    %c0_91 = arith.constant 0 : index
    %161 = arith.index_cast %160 : i32 to index
    %c0_92 = arith.constant 0 : index
    %c0_93 = arith.constant 0 : index
    %162 = vector.load %arg3[%c0_91, %161, %c0_92, %c0_93] : memref<2x8x9x128xf32, #tpu.memory_space<vmem>>, vector<2x1x9x128xf32>
    %163 = vector.shape_cast %162 : vector<2x1x9x128xf32> to vector<2x9x128xf32>
    %164 = vector.shape_cast %2 : vector<9x128xi1> to vector<1x9x128xi1>
    %165 = vector.broadcast %164 : vector<1x9x128xi1> to vector<2x9x128xi1>
    %166 = arith.select %165, %163, %149 : vector<2x9x128xi1>, vector<2x9x128xf32>
    %c2_i32_94 = arith.constant 2 : i32
    %167 = arith.addi %146, %c2_i32_94 : i32
    %c8_i32_95 = arith.constant 8 : i32
    %c0_i32_96 = arith.constant 0 : i32
    %168 = arith.cmpi eq, %c8_i32_95, %c0_i32_96 : i32
    %c1_i32_97 = arith.constant 1 : i32
    %169 = arith.select %168, %c1_i32_97, %c8_i32_95 : i32
    %170 = arith.remsi %167, %169 : i32
    %c0_i32_98 = arith.constant 0 : i32
    %171 = arith.cmpi ne, %170, %c0_i32_98 : i32
    %c0_i32_99 = arith.constant 0 : i32
    %172 = arith.cmpi slt, %170, %c0_i32_99 : i32
    %c0_i32_100 = arith.constant 0 : i32
    %173 = arith.cmpi slt, %169, %c0_i32_100 : i32
    %174 = arith.xori %172, %173 : i1
    %175 = arith.andi %174, %171 : i1
    %176 = arith.addi %170, %169 : i32
    %177 = arith.select %175, %176, %170 : i32
    %c0_101 = arith.constant 0 : index
    %178 = arith.index_cast %177 : i32 to index
    %c0_102 = arith.constant 0 : index
    %c0_103 = arith.constant 0 : index
    %179 = vector.load %arg3[%c0_101, %178, %c0_102, %c0_103] : memref<2x8x9x128xf32, #tpu.memory_space<vmem>>, vector<2x1x9x128xf32>
    %180 = vector.shape_cast %179 : vector<2x1x9x128xf32> to vector<2x9x128xf32>
    %181 = vector.shape_cast %4 : vector<9x128xi1> to vector<1x9x128xi1>
    %182 = vector.broadcast %181 : vector<1x9x128xi1> to vector<2x9x128xi1>
    %183 = arith.select %182, %180, %166 : vector<2x9x128xi1>, vector<2x9x128xf32>
    %c3_i32_104 = arith.constant 3 : i32
    %184 = arith.addi %146, %c3_i32_104 : i32
    %c8_i32_105 = arith.constant 8 : i32
    %c0_i32_106 = arith.constant 0 : i32
    %185 = arith.cmpi eq, %c8_i32_105, %c0_i32_106 : i32
    %c1_i32_107 = arith.constant 1 : i32
    %186 = arith.select %185, %c1_i32_107, %c8_i32_105 : i32
    %187 = arith.remsi %184, %186 : i32
    %c0_i32_108 = arith.constant 0 : i32
    %188 = arith.cmpi ne, %187, %c0_i32_108 : i32
    %c0_i32_109 = arith.constant 0 : i32
    %189 = arith.cmpi slt, %187, %c0_i32_109 : i32
    %c0_i32_110 = arith.constant 0 : i32
    %190 = arith.cmpi slt, %186, %c0_i32_110 : i32
    %191 = arith.xori %189, %190 : i1
    %192 = arith.andi %191, %188 : i1
    %193 = arith.addi %187, %186 : i32
    %194 = arith.select %192, %193, %187 : i32
    %c0_111 = arith.constant 0 : index
    %195 = arith.index_cast %194 : i32 to index
    %c0_112 = arith.constant 0 : index
    %c0_113 = arith.constant 0 : index
    %196 = vector.load %arg3[%c0_111, %195, %c0_112, %c0_113] : memref<2x8x9x128xf32, #tpu.memory_space<vmem>>, vector<2x1x9x128xf32>
    %197 = vector.shape_cast %196 : vector<2x1x9x128xf32> to vector<2x9x128xf32>
    %198 = vector.shape_cast %6 : vector<9x128xi1> to vector<1x9x128xi1>
    %199 = vector.broadcast %198 : vector<1x9x128xi1> to vector<2x9x128xi1>
    %200 = arith.select %199, %197, %183 : vector<2x9x128xi1>, vector<2x9x128xf32>
    %c4_i32_114 = arith.constant 4 : i32
    %201 = arith.addi %146, %c4_i32_114 : i32
    %c8_i32_115 = arith.constant 8 : i32
    %c0_i32_116 = arith.constant 0 : i32
    %202 = arith.cmpi eq, %c8_i32_115, %c0_i32_116 : i32
    %c1_i32_117 = arith.constant 1 : i32
    %203 = arith.select %202, %c1_i32_117, %c8_i32_115 : i32
    %204 = arith.remsi %201, %203 : i32
    %c0_i32_118 = arith.constant 0 : i32
    %205 = arith.cmpi ne, %204, %c0_i32_118 : i32
    %c0_i32_119 = arith.constant 0 : i32
    %206 = arith.cmpi slt, %204, %c0_i32_119 : i32
    %c0_i32_120 = arith.constant 0 : i32
    %207 = arith.cmpi slt, %203, %c0_i32_120 : i32
    %208 = arith.xori %206, %207 : i1
    %209 = arith.andi %208, %205 : i1
    %210 = arith.addi %204, %203 : i32
    %211 = arith.select %209, %210, %204 : i32
    %c0_121 = arith.constant 0 : index
    %212 = arith.index_cast %211 : i32 to index
    %c0_122 = arith.constant 0 : index
    %c0_123 = arith.constant 0 : index
    %213 = vector.load %arg3[%c0_121, %212, %c0_122, %c0_123] : memref<2x8x9x128xf32, #tpu.memory_space<vmem>>, vector<2x1x9x128xf32>
    %214 = vector.shape_cast %213 : vector<2x1x9x128xf32> to vector<2x9x128xf32>
    %215 = vector.shape_cast %11 : vector<9x128xi1> to vector<1x9x128xi1>
    %216 = vector.broadcast %215 : vector<1x9x128xi1> to vector<2x9x128xi1>
    %217 = arith.select %216, %214, %200 : vector<2x9x128xi1>, vector<2x9x128xf32>
    %c5_i32_124 = arith.constant 5 : i32
    %218 = arith.addi %146, %c5_i32_124 : i32
    %c8_i32_125 = arith.constant 8 : i32
    %c0_i32_126 = arith.constant 0 : i32
    %219 = arith.cmpi eq, %c8_i32_125, %c0_i32_126 : i32
    %c1_i32_127 = arith.constant 1 : i32
    %220 = arith.select %219, %c1_i32_127, %c8_i32_125 : i32
    %221 = arith.remsi %218, %220 : i32
    %c0_i32_128 = arith.constant 0 : i32
    %222 = arith.cmpi ne, %221, %c0_i32_128 : i32
    %c0_i32_129 = arith.constant 0 : i32
    %223 = arith.cmpi slt, %221, %c0_i32_129 : i32
    %c0_i32_130 = arith.constant 0 : i32
    %224 = arith.cmpi slt, %220, %c0_i32_130 : i32
    %225 = arith.xori %223, %224 : i1
    %226 = arith.andi %225, %222 : i1
    %227 = arith.addi %221, %220 : i32
    %228 = arith.select %226, %227, %221 : i32
    %c0_131 = arith.constant 0 : index
    %229 = arith.index_cast %228 : i32 to index
    %c0_132 = arith.constant 0 : index
    %c0_133 = arith.constant 0 : index
    %230 = vector.load %arg3[%c0_131, %229, %c0_132, %c0_133] : memref<2x8x9x128xf32, #tpu.memory_space<vmem>>, vector<2x1x9x128xf32>
    %231 = vector.shape_cast %230 : vector<2x1x9x128xf32> to vector<2x9x128xf32>
    %232 = vector.shape_cast %13 : vector<9x128xi1> to vector<1x9x128xi1>
    %233 = vector.broadcast %232 : vector<1x9x128xi1> to vector<2x9x128xi1>
    %234 = arith.select %233, %231, %217 : vector<2x9x128xi1>, vector<2x9x128xf32>
    %c6_i32_134 = arith.constant 6 : i32
    %235 = arith.addi %146, %c6_i32_134 : i32
    %c8_i32_135 = arith.constant 8 : i32
    %c0_i32_136 = arith.constant 0 : i32
    %236 = arith.cmpi eq, %c8_i32_135, %c0_i32_136 : i32
    %c1_i32_137 = arith.constant 1 : i32
    %237 = arith.select %236, %c1_i32_137, %c8_i32_135 : i32
    %238 = arith.remsi %235, %237 : i32
    %c0_i32_138 = arith.constant 0 : i32
    %239 = arith.cmpi ne, %238, %c0_i32_138 : i32
    %c0_i32_139 = arith.constant 0 : i32
    %240 = arith.cmpi slt, %238, %c0_i32_139 : i32
    %c0_i32_140 = arith.constant 0 : i32
    %241 = arith.cmpi slt, %237, %c0_i32_140 : i32
    %242 = arith.xori %240, %241 : i1
    %243 = arith.andi %242, %239 : i1
    %244 = arith.addi %238, %237 : i32
    %245 = arith.select %243, %244, %238 : i32
    %c0_141 = arith.constant 0 : index
    %246 = arith.index_cast %245 : i32 to index
    %c0_142 = arith.constant 0 : index
    %c0_143 = arith.constant 0 : index
    %247 = vector.load %arg3[%c0_141, %246, %c0_142, %c0_143] : memref<2x8x9x128xf32, #tpu.memory_space<vmem>>, vector<2x1x9x128xf32>
    %248 = vector.shape_cast %247 : vector<2x1x9x128xf32> to vector<2x9x128xf32>
    %249 = vector.shape_cast %15 : vector<9x128xi1> to vector<1x9x128xi1>
    %250 = vector.broadcast %249 : vector<1x9x128xi1> to vector<2x9x128xi1>
    %251 = arith.select %250, %248, %234 : vector<2x9x128xi1>, vector<2x9x128xf32>
    %c7_i32_144 = arith.constant 7 : i32
    %252 = arith.addi %146, %c7_i32_144 : i32
    %c8_i32_145 = arith.constant 8 : i32
    %c0_i32_146 = arith.constant 0 : i32
    %253 = arith.cmpi eq, %c8_i32_145, %c0_i32_146 : i32
    %c1_i32_147 = arith.constant 1 : i32
    %254 = arith.select %253, %c1_i32_147, %c8_i32_145 : i32
    %255 = arith.remsi %252, %254 : i32
    %c0_i32_148 = arith.constant 0 : i32
    %256 = arith.cmpi ne, %255, %c0_i32_148 : i32
    %c0_i32_149 = arith.constant 0 : i32
    %257 = arith.cmpi slt, %255, %c0_i32_149 : i32
    %c0_i32_150 = arith.constant 0 : i32
    %258 = arith.cmpi slt, %254, %c0_i32_150 : i32
    %259 = arith.xori %257, %258 : i1
    %260 = arith.andi %259, %256 : i1
    %261 = arith.addi %255, %254 : i32
    %262 = arith.select %260, %261, %255 : i32
    %c0_151 = arith.constant 0 : index
    %263 = arith.index_cast %262 : i32 to index
    %c0_152 = arith.constant 0 : index
    %c0_153 = arith.constant 0 : index
    %264 = vector.load %arg3[%c0_151, %263, %c0_152, %c0_153] : memref<2x8x9x128xf32, #tpu.memory_space<vmem>>, vector<2x1x9x128xf32>
    %265 = vector.shape_cast %264 : vector<2x1x9x128xf32> to vector<2x9x128xf32>
    %266 = vector.shape_cast %17 : vector<9x128xi1> to vector<1x9x128xi1>
    %267 = vector.broadcast %266 : vector<1x9x128xi1> to vector<2x9x128xi1>
    %268 = arith.select %267, %265, %251 : vector<2x9x128xi1>, vector<2x9x128xf32>
    %c0_154 = arith.constant 0 : index
    %c1 = arith.constant 1 : index
    %c0_155 = arith.constant 0 : index
    %c0_156 = arith.constant 0 : index
    %269 = vector.load %arg4[%c0_154, %c1, %c0_155, %c0_156] : memref<2x8x9x128xf32, #tpu.memory_space<vmem>>, vector<2x1x9x128xf32>
    %270 = vector.shape_cast %269 : vector<2x1x9x128xf32> to vector<2x9x128xf32>
    %271 = vector.shape_cast %268 : vector<2x9x128xf32> to vector<2x1x9x128xf32>
    tpu.vector_store %arg4[%c0_154, %c1, %c0_155, %c0_156], %271 {strides = array<i32>} : memref<2x8x9x128xf32, #tpu.memory_space<vmem>>, vector<2x1x9x128xf32>,
    %c8_i32_157 = arith.constant 8 : i32
    %272 = arith.muli %arg1, %c8_i32_157 : i32
    %c2_i32_158 = arith.constant 2 : i32
    %273 = arith.addi %272, %c2_i32_158 : i32
    %c0_159 = arith.constant 0 : index
    %274 = arith.index_cast %273 : i32 to index
    %c0_160 = arith.constant 0 : index
    %c0_161 = arith.constant 0 : index
    %275 = vector.load %arg3[%c0_159, %274, %c0_160, %c0_161] : memref<2x8x9x128xf32, #tpu.memory_space<vmem>>, vector<2x1x9x128xf32>
    %276 = vector.shape_cast %275 : vector<2x1x9x128xf32> to vector<2x9x128xf32>
    %c1_i32_162 = arith.constant 1 : i32
    %277 = arith.addi %273, %c1_i32_162 : i32
    %c8_i32_163 = arith.constant 8 : i32
    %c0_i32_164 = arith.constant 0 : i32
    %278 = arith.cmpi eq, %c8_i32_163, %c0_i32_164 : i32
    %c1_i32_165 = arith.constant 1 : i32
    %279 = arith.select %278, %c1_i32_165, %c8_i32_163 : i32
    %280 = arith.remsi %277, %279 : i32
    %c0_i32_166 = arith.constant 0 : i32
    %281 = arith.cmpi ne, %280, %c0_i32_166 : i32
    %c0_i32_167 = arith.constant 0 : i32
    %282 = arith.cmpi slt, %280, %c0_i32_167 : i32
    %c0_i32_168 = arith.constant 0 : i32
    %283 = arith.cmpi slt, %279, %c0_i32_168 : i32
    %284 = arith.xori %282, %283 : i1
    %285 = arith.andi %284, %281 : i1
    %286 = arith.addi %280, %279 : i32
    %287 = arith.select %285, %286, %280 : i32
    %c0_169 = arith.constant 0 : index
    %288 = arith.index_cast %287 : i32 to index
    %c0_170 = arith.constant 0 : index
    %c0_171 = arith.constant 0 : index
    %289 = vector.load %arg3[%c0_169, %288, %c0_170, %c0_171] : memref<2x8x9x128xf32, #tpu.memory_space<vmem>>, vector<2x1x9x128xf32>
    %290 = vector.shape_cast %289 : vector<2x1x9x128xf32> to vector<2x9x128xf32>
    %291 = vector.shape_cast %2 : vector<9x128xi1> to vector<1x9x128xi1>
    %292 = vector.broadcast %291 : vector<1x9x128xi1> to vector<2x9x128xi1>
    %293 = arith.select %292, %290, %276 : vector<2x9x128xi1>, vector<2x9x128xf32>
    %c2_i32_172 = arith.constant 2 : i32
    %294 = arith.addi %273, %c2_i32_172 : i32
    %c8_i32_173 = arith.constant 8 : i32
    %c0_i32_174 = arith.constant 0 : i32
    %295 = arith.cmpi eq, %c8_i32_173, %c0_i32_174 : i32
    %c1_i32_175 = arith.constant 1 : i32
    %296 = arith.select %295, %c1_i32_175, %c8_i32_173 : i32
    %297 = arith.remsi %294, %296 : i32
    %c0_i32_176 = arith.constant 0 : i32
    %298 = arith.cmpi ne, %297, %c0_i32_176 : i32
    %c0_i32_177 = arith.constant 0 : i32
    %299 = arith.cmpi slt, %297, %c0_i32_177 : i32
    %c0_i32_178 = arith.constant 0 : i32
    %300 = arith.cmpi slt, %296, %c0_i32_178 : i32
    %301 = arith.xori %299, %300 : i1
    %302 = arith.andi %301, %298 : i1
    %303 = arith.addi %297, %296 : i32
    %304 = arith.select %302, %303, %297 : i32
    %c0_179 = arith.constant 0 : index
    %305 = arith.index_cast %304 : i32 to index
    %c0_180 = arith.constant 0 : index
    %c0_181 = arith.constant 0 : index
    %306 = vector.load %arg3[%c0_179, %305, %c0_180, %c0_181] : memref<2x8x9x128xf32, #tpu.memory_space<vmem>>, vector<2x1x9x128xf32>
    %307 = vector.shape_cast %306 : vector<2x1x9x128xf32> to vector<2x9x128xf32>
    %308 = vector.shape_cast %4 : vector<9x128xi1> to vector<1x9x128xi1>
    %309 = vector.broadcast %308 : vector<1x9x128xi1> to vector<2x9x128xi1>
    %310 = arith.select %309, %307, %293 : vector<2x9x128xi1>, vector<2x9x128xf32>
    %c3_i32_182 = arith.constant 3 : i32
    %311 = arith.addi %273, %c3_i32_182 : i32
    %c8_i32_183 = arith.constant 8 : i32
    %c0_i32_184 = arith.constant 0 : i32
    %312 = arith.cmpi eq, %c8_i32_183, %c0_i32_184 : i32
    %c1_i32_185 = arith.constant 1 : i32
    %313 = arith.select %312, %c1_i32_185, %c8_i32_183 : i32
    %314 = arith.remsi %311, %313 : i32
    %c0_i32_186 = arith.constant 0 : i32
    %315 = arith.cmpi ne, %314, %c0_i32_186 : i32
    %c0_i32_187 = arith.constant 0 : i32
    %316 = arith.cmpi slt, %314, %c0_i32_187 : i32
    %c0_i32_188 = arith.constant 0 : i32
    %317 = arith.cmpi slt, %313, %c0_i32_188 : i32
    %318 = arith.xori %316, %317 : i1
    %319 = arith.andi %318, %315 : i1
    %320 = arith.addi %314, %313 : i32
    %321 = arith.select %319, %320, %314 : i32
    %c0_189 = arith.constant 0 : index
    %322 = arith.index_cast %321 : i32 to index
    %c0_190 = arith.constant 0 : index
    %c0_191 = arith.constant 0 : index
    %323 = vector.load %arg3[%c0_189, %322, %c0_190, %c0_191] : memref<2x8x9x128xf32, #tpu.memory_space<vmem>>, vector<2x1x9x128xf32>
    %324 = vector.shape_cast %323 : vector<2x1x9x128xf32> to vector<2x9x128xf32>
    %325 = vector.shape_cast %6 : vector<9x128xi1> to vector<1x9x128xi1>
    %326 = vector.broadcast %325 : vector<1x9x128xi1> to vector<2x9x128xi1>
    %327 = arith.select %326, %324, %310 : vector<2x9x128xi1>, vector<2x9x128xf32>
    %c4_i32_192 = arith.constant 4 : i32
    %328 = arith.addi %273, %c4_i32_192 : i32
    %c8_i32_193 = arith.constant 8 : i32
    %c0_i32_194 = arith.constant 0 : i32
    %329 = arith.cmpi eq, %c8_i32_193, %c0_i32_194 : i32
    %c1_i32_195 = arith.constant 1 : i32
    %330 = arith.select %329, %c1_i32_195, %c8_i32_193 : i32
    %331 = arith.remsi %328, %330 : i32
    %c0_i32_196 = arith.constant 0 : i32
    %332 = arith.cmpi ne, %331, %c0_i32_196 : i32
    %c0_i32_197 = arith.constant 0 : i32
    %333 = arith.cmpi slt, %331, %c0_i32_197 : i32
    %c0_i32_198 = arith.constant 0 : i32
    %334 = arith.cmpi slt, %330, %c0_i32_198 : i32
    %335 = arith.xori %333, %334 : i1
    %336 = arith.andi %335, %332 : i1
    %337 = arith.addi %331, %330 : i32
    %338 = arith.select %336, %337, %331 : i32
    %c0_199 = arith.constant 0 : index
    %339 = arith.index_cast %338 : i32 to index
    %c0_200 = arith.constant 0 : index
    %c0_201 = arith.constant 0 : index
    %340 = vector.load %arg3[%c0_199, %339, %c0_200, %c0_201] : memref<2x8x9x128xf32, #tpu.memory_space<vmem>>, vector<2x1x9x128xf32>
    %341 = vector.shape_cast %340 : vector<2x1x9x128xf32> to vector<2x9x128xf32>
    %342 = vector.shape_cast %11 : vector<9x128xi1> to vector<1x9x128xi1>
    %343 = vector.broadcast %342 : vector<1x9x128xi1> to vector<2x9x128xi1>
    %344 = arith.select %343, %341, %327 : vector<2x9x128xi1>, vector<2x9x128xf32>
    %c5_i32_202 = arith.constant 5 : i32
    %345 = arith.addi %273, %c5_i32_202 : i32
    %c8_i32_203 = arith.constant 8 : i32
    %c0_i32_204 = arith.constant 0 : i32
    %346 = arith.cmpi eq, %c8_i32_203, %c0_i32_204 : i32
    %c1_i32_205 = arith.constant 1 : i32
    %347 = arith.select %346, %c1_i32_205, %c8_i32_203 : i32
    %348 = arith.remsi %345, %347 : i32
    %c0_i32_206 = arith.constant 0 : i32
    %349 = arith.cmpi ne, %348, %c0_i32_206 : i32
    %c0_i32_207 = arith.constant 0 : i32
    %350 = arith.cmpi slt, %348, %c0_i32_207 : i32
    %c0_i32_208 = arith.constant 0 : i32
    %351 = arith.cmpi slt, %347, %c0_i32_208 : i32
    %352 = arith.xori %350, %351 : i1
    %353 = arith.andi %352, %349 : i1
    %354 = arith.addi %348, %347 : i32
    %355 = arith.select %353, %354, %348 : i32
    %c0_209 = arith.constant 0 : index
    %356 = arith.index_cast %355 : i32 to index
    %c0_210 = arith.constant 0 : index
    %c0_211 = arith.constant 0 : index
    %357 = vector.load %arg3[%c0_209, %356, %c0_210, %c0_211] : memref<2x8x9x128xf32, #tpu.memory_space<vmem>>, vector<2x1x9x128xf32>
    %358 = vector.shape_cast %357 : vector<2x1x9x128xf32> to vector<2x9x128xf32>
    %359 = vector.shape_cast %13 : vector<9x128xi1> to vector<1x9x128xi1>
    %360 = vector.broadcast %359 : vector<1x9x128xi1> to vector<2x9x128xi1>
    %361 = arith.select %360, %358, %344 : vector<2x9x128xi1>, vector<2x9x128xf32>
    %c6_i32_212 = arith.constant 6 : i32
    %362 = arith.addi %273, %c6_i32_212 : i32
    %c8_i32_213 = arith.constant 8 : i32
    %c0_i32_214 = arith.constant 0 : i32
    %363 = arith.cmpi eq, %c8_i32_213, %c0_i32_214 : i32
    %c1_i32_215 = arith.constant 1 : i32
    %364 = arith.select %363, %c1_i32_215, %c8_i32_213 : i32
    %365 = arith.remsi %362, %364 : i32
    %c0_i32_216 = arith.constant 0 : i32
    %366 = arith.cmpi ne, %365, %c0_i32_216 : i32
    %c0_i32_217 = arith.constant 0 : i32
    %367 = arith.cmpi slt, %365, %c0_i32_217 : i32
    %c0_i32_218 = arith.constant 0 : i32
    %368 = arith.cmpi slt, %364, %c0_i32_218 : i32
    %369 = arith.xori %367, %368 : i1
    %370 = arith.andi %369, %366 : i1
    %371 = arith.addi %365, %364 : i32
    %372 = arith.select %370, %371, %365 : i32
    %c0_219 = arith.constant 0 : index
    %373 = arith.index_cast %372 : i32 to index
    %c0_220 = arith.constant 0 : index
    %c0_221 = arith.constant 0 : index
    %374 = vector.load %arg3[%c0_219, %373, %c0_220, %c0_221] : memref<2x8x9x128xf32, #tpu.memory_space<vmem>>, vector<2x1x9x128xf32>
    %375 = vector.shape_cast %374 : vector<2x1x9x128xf32> to vector<2x9x128xf32>
    %376 = vector.shape_cast %15 : vector<9x128xi1> to vector<1x9x128xi1>
    %377 = vector.broadcast %376 : vector<1x9x128xi1> to vector<2x9x128xi1>
    %378 = arith.select %377, %375, %361 : vector<2x9x128xi1>, vector<2x9x128xf32>
    %c7_i32_222 = arith.constant 7 : i32
    %379 = arith.addi %273, %c7_i32_222 : i32
    %c8_i32_223 = arith.constant 8 : i32
    %c0_i32_224 = arith.constant 0 : i32
    %380 = arith.cmpi eq, %c8_i32_223, %c0_i32_224 : i32
    %c1_i32_225 = arith.constant 1 : i32
    %381 = arith.select %380, %c1_i32_225, %c8_i32_223 : i32
    %382 = arith.remsi %379, %381 : i32
    %c0_i32_226 = arith.constant 0 : i32
    %383 = arith.cmpi ne, %382, %c0_i32_226 : i32
    %c0_i32_227 = arith.constant 0 : i32
    %384 = arith.cmpi slt, %382, %c0_i32_227 : i32
    %c0_i32_228 = arith.constant 0 : i32
    %385 = arith.cmpi slt, %381, %c0_i32_228 : i32
    %386 = arith.xori %384, %385 : i1
    %387 = arith.andi %386, %383 : i1
    %388 = arith.addi %382, %381 : i32
    %389 = arith.select %387, %388, %382 : i32
    %c0_229 = arith.constant 0 : index
    %390 = arith.index_cast %389 : i32 to index
    %c0_230 = arith.constant 0 : index
    %c0_231 = arith.constant 0 : index
    %391 = vector.load %arg3[%c0_229, %390, %c0_230, %c0_231] : memref<2x8x9x128xf32, #tpu.memory_space<vmem>>, vector<2x1x9x128xf32>
    %392 = vector.shape_cast %391 : vector<2x1x9x128xf32> to vector<2x9x128xf32>
    %393 = vector.shape_cast %17 : vector<9x128xi1> to vector<1x9x128xi1>
    %394 = vector.broadcast %393 : vector<1x9x128xi1> to vector<2x9x128xi1>
    %395 = arith.select %394, %392, %378 : vector<2x9x128xi1>, vector<2x9x128xf32>
    %c0_232 = arith.constant 0 : index
    %c2 = arith.constant 2 : index
    %c0_233 = arith.constant 0 : index
    %c0_234 = arith.constant 0 : index
    %396 = vector.load %arg4[%c0_232, %c2, %c0_233, %c0_234] : memref<2x8x9x128xf32, #tpu.memory_space<vmem>>, vector<2x1x9x128xf32>
    %397 = vector.shape_cast %396 : vector<2x1x9x128xf32> to vector<2x9x128xf32>
    %398 = vector.shape_cast %395 : vector<2x9x128xf32> to vector<2x1x9x128xf32>
    tpu.vector_store %arg4[%c0_232, %c2, %c0_233, %c0_234], %398 {strides = array<i32>} : memref<2x8x9x128xf32, #tpu.memory_space<vmem>>, vector<2x1x9x128xf32>,
    %c8_i32_235 = arith.constant 8 : i32
    %399 = arith.muli %arg1, %c8_i32_235 : i32
    %c3_i32_236 = arith.constant 3 : i32
    %400 = arith.addi %399, %c3_i32_236 : i32
    %c0_237 = arith.constant 0 : index
    %401 = arith.index_cast %400 : i32 to index
    %c0_238 = arith.constant 0 : index
    %c0_239 = arith.constant 0 : index
    %402 = vector.load %arg3[%c0_237, %401, %c0_238, %c0_239] : memref<2x8x9x128xf32, #tpu.memory_space<vmem>>, vector<2x1x9x128xf32>
    %403 = vector.shape_cast %402 : vector<2x1x9x128xf32> to vector<2x9x128xf32>
    %c1_i32_240 = arith.constant 1 : i32
    %404 = arith.addi %400, %c1_i32_240 : i32
    %c8_i32_241 = arith.constant 8 : i32
    %c0_i32_242 = arith.constant 0 : i32
    %405 = arith.cmpi eq, %c8_i32_241, %c0_i32_242 : i32
    %c1_i32_243 = arith.constant 1 : i32
    %406 = arith.select %405, %c1_i32_243, %c8_i32_241 : i32
    %407 = arith.remsi %404, %406 : i32
    %c0_i32_244 = arith.constant 0 : i32
    %408 = arith.cmpi ne, %407, %c0_i32_244 : i32
    %c0_i32_245 = arith.constant 0 : i32
    %409 = arith.cmpi slt, %407, %c0_i32_245 : i32
    %c0_i32_246 = arith.constant 0 : i32
    %410 = arith.cmpi slt, %406, %c0_i32_246 : i32
    %411 = arith.xori %409, %410 : i1
    %412 = arith.andi %411, %408 : i1
    %413 = arith.addi %407, %406 : i32
    %414 = arith.select %412, %413, %407 : i32
    %c0_247 = arith.constant 0 : index
    %415 = arith.index_cast %414 : i32 to index
    %c0_248 = arith.constant 0 : index
    %c0_249 = arith.constant 0 : index
    %416 = vector.load %arg3[%c0_247, %415, %c0_248, %c0_249] : memref<2x8x9x128xf32, #tpu.memory_space<vmem>>, vector<2x1x9x128xf32>
    %417 = vector.shape_cast %416 : vector<2x1x9x128xf32> to vector<2x9x128xf32>
    %418 = vector.shape_cast %2 : vector<9x128xi1> to vector<1x9x128xi1>
    %419 = vector.broadcast %418 : vector<1x9x128xi1> to vector<2x9x128xi1>
    %420 = arith.select %419, %417, %403 : vector<2x9x128xi1>, vector<2x9x128xf32>
    %c2_i32_250 = arith.constant 2 : i32
    %421 = arith.addi %400, %c2_i32_250 : i32
    %c8_i32_251 = arith.constant 8 : i32
    %c0_i32_252 = arith.constant 0 : i32
    %422 = arith.cmpi eq, %c8_i32_251, %c0_i32_252 : i32
    %c1_i32_253 = arith.constant 1 : i32
    %423 = arith.select %422, %c1_i32_253, %c8_i32_251 : i32
    %424 = arith.remsi %421, %423 : i32
    %c0_i32_254 = arith.constant 0 : i32
    %425 = arith.cmpi ne, %424, %c0_i32_254 : i32
    %c0_i32_255 = arith.constant 0 : i32
    %426 = arith.cmpi slt, %424, %c0_i32_255 : i32
    %c0_i32_256 = arith.constant 0 : i32
    %427 = arith.cmpi slt, %423, %c0_i32_256 : i32
    %428 = arith.xori %426, %427 : i1
    %429 = arith.andi %428, %425 : i1
    %430 = arith.addi %424, %423 : i32
    %431 = arith.select %429, %430, %424 : i32
    %c0_257 = arith.constant 0 : index
    %432 = arith.index_cast %431 : i32 to index
    %c0_258 = arith.constant 0 : index
    %c0_259 = arith.constant 0 : index
    %433 = vector.load %arg3[%c0_257, %432, %c0_258, %c0_259] : memref<2x8x9x128xf32, #tpu.memory_space<vmem>>, vector<2x1x9x128xf32>
    %434 = vector.shape_cast %433 : vector<2x1x9x128xf32> to vector<2x9x128xf32>
    %435 = vector.shape_cast %4 : vector<9x128xi1> to vector<1x9x128xi1>
    %436 = vector.broadcast %435 : vector<1x9x128xi1> to vector<2x9x128xi1>
    %437 = arith.select %436, %434, %420 : vector<2x9x128xi1>, vector<2x9x128xf32>
    %c3_i32_260 = arith.constant 3 : i32
    %438 = arith.addi %400, %c3_i32_260 : i32
    %c8_i32_261 = arith.constant 8 : i32
    %c0_i32_262 = arith.constant 0 : i32
    %439 = arith.cmpi eq, %c8_i32_261, %c0_i32_262 : i32
    %c1_i32_263 = arith.constant 1 : i32
    %440 = arith.select %439, %c1_i32_263, %c8_i32_261 : i32
    %441 = arith.remsi %438, %440 : i32
    %c0_i32_264 = arith.constant 0 : i32
    %442 = arith.cmpi ne, %441, %c0_i32_264 : i32
    %c0_i32_265 = arith.constant 0 : i32
    %443 = arith.cmpi slt, %441, %c0_i32_265 : i32
    %c0_i32_266 = arith.constant 0 : i32
    %444 = arith.cmpi slt, %440, %c0_i32_266 : i32
    %445 = arith.xori %443, %444 : i1
    %446 = arith.andi %445, %442 : i1
    %447 = arith.addi %441, %440 : i32
    %448 = arith.select %446, %447, %441 : i32
    %c0_267 = arith.constant 0 : index
    %449 = arith.index_cast %448 : i32 to index
    %c0_268 = arith.constant 0 : index
    %c0_269 = arith.constant 0 : index
    %450 = vector.load %arg3[%c0_267, %449, %c0_268, %c0_269] : memref<2x8x9x128xf32, #tpu.memory_space<vmem>>, vector<2x1x9x128xf32>
    %451 = vector.shape_cast %450 : vector<2x1x9x128xf32> to vector<2x9x128xf32>
    %452 = vector.shape_cast %6 : vector<9x128xi1> to vector<1x9x128xi1>
    %453 = vector.broadcast %452 : vector<1x9x128xi1> to vector<2x9x128xi1>
    %454 = arith.select %453, %451, %437 : vector<2x9x128xi1>, vector<2x9x128xf32>
    %c4_i32_270 = arith.constant 4 : i32
    %455 = arith.addi %400, %c4_i32_270 : i32
    %c8_i32_271 = arith.constant 8 : i32
    %c0_i32_272 = arith.constant 0 : i32
    %456 = arith.cmpi eq, %c8_i32_271, %c0_i32_272 : i32
    %c1_i32_273 = arith.constant 1 : i32
    %457 = arith.select %456, %c1_i32_273, %c8_i32_271 : i32
    %458 = arith.remsi %455, %457 : i32
    %c0_i32_274 = arith.constant 0 : i32
    %459 = arith.cmpi ne, %458, %c0_i32_274 : i32
    %c0_i32_275 = arith.constant 0 : i32
    %460 = arith.cmpi slt, %458, %c0_i32_275 : i32
    %c0_i32_276 = arith.constant 0 : i32
    %461 = arith.cmpi slt, %457, %c0_i32_276 : i32
    %462 = arith.xori %460, %461 : i1
    %463 = arith.andi %462, %459 : i1
    %464 = arith.addi %458, %457 : i32
    %465 = arith.select %463, %464, %458 : i32
    %c0_277 = arith.constant 0 : index
    %466 = arith.index_cast %465 : i32 to index
    %c0_278 = arith.constant 0 : index
    %c0_279 = arith.constant 0 : index
    %467 = vector.load %arg3[%c0_277, %466, %c0_278, %c0_279] : memref<2x8x9x128xf32, #tpu.memory_space<vmem>>, vector<2x1x9x128xf32>
    %468 = vector.shape_cast %467 : vector<2x1x9x128xf32> to vector<2x9x128xf32>
    %469 = vector.shape_cast %11 : vector<9x128xi1> to vector<1x9x128xi1>
    %470 = vector.broadcast %469 : vector<1x9x128xi1> to vector<2x9x128xi1>
    %471 = arith.select %470, %468, %454 : vector<2x9x128xi1>, vector<2x9x128xf32>
    %c5_i32_280 = arith.constant 5 : i32
    %472 = arith.addi %400, %c5_i32_280 : i32
    %c8_i32_281 = arith.constant 8 : i32
    %c0_i32_282 = arith.constant 0 : i32
    %473 = arith.cmpi eq, %c8_i32_281, %c0_i32_282 : i32
    %c1_i32_283 = arith.constant 1 : i32
    %474 = arith.select %473, %c1_i32_283, %c8_i32_281 : i32
    %475 = arith.remsi %472, %474 : i32
    %c0_i32_284 = arith.constant 0 : i32
    %476 = arith.cmpi ne, %475, %c0_i32_284 : i32
    %c0_i32_285 = arith.constant 0 : i32
    %477 = arith.cmpi slt, %475, %c0_i32_285 : i32
    %c0_i32_286 = arith.constant 0 : i32
    %478 = arith.cmpi slt, %474, %c0_i32_286 : i32
    %479 = arith.xori %477, %478 : i1
    %480 = arith.andi %479, %476 : i1
    %481 = arith.addi %475, %474 : i32
    %482 = arith.select %480, %481, %475 : i32
    %c0_287 = arith.constant 0 : index
    %483 = arith.index_cast %482 : i32 to index
    %c0_288 = arith.constant 0 : index
    %c0_289 = arith.constant 0 : index
    %484 = vector.load %arg3[%c0_287, %483, %c0_288, %c0_289] : memref<2x8x9x128xf32, #tpu.memory_space<vmem>>, vector<2x1x9x128xf32>
    %485 = vector.shape_cast %484 : vector<2x1x9x128xf32> to vector<2x9x128xf32>
    %486 = vector.shape_cast %13 : vector<9x128xi1> to vector<1x9x128xi1>
    %487 = vector.broadcast %486 : vector<1x9x128xi1> to vector<2x9x128xi1>
    %488 = arith.select %487, %485, %471 : vector<2x9x128xi1>, vector<2x9x128xf32>
    %c6_i32_290 = arith.constant 6 : i32
    %489 = arith.addi %400, %c6_i32_290 : i32
    %c8_i32_291 = arith.constant 8 : i32
    %c0_i32_292 = arith.constant 0 : i32
    %490 = arith.cmpi eq, %c8_i32_291, %c0_i32_292 : i32
    %c1_i32_293 = arith.constant 1 : i32
    %491 = arith.select %490, %c1_i32_293, %c8_i32_291 : i32
    %492 = arith.remsi %489, %491 : i32
    %c0_i32_294 = arith.constant 0 : i32
    %493 = arith.cmpi ne, %492, %c0_i32_294 : i32
    %c0_i32_295 = arith.constant 0 : i32
    %494 = arith.cmpi slt, %492, %c0_i32_295 : i32
    %c0_i32_296 = arith.constant 0 : i32
    %495 = arith.cmpi slt, %491, %c0_i32_296 : i32
    %496 = arith.xori %494, %495 : i1
    %497 = arith.andi %496, %493 : i1
    %498 = arith.addi %492, %491 : i32
    %499 = arith.select %497, %498, %492 : i32
    %c0_297 = arith.constant 0 : index
    %500 = arith.index_cast %499 : i32 to index
    %c0_298 = arith.constant 0 : index
    %c0_299 = arith.constant 0 : index
    %501 = vector.load %arg3[%c0_297, %500, %c0_298, %c0_299] : memref<2x8x9x128xf32, #tpu.memory_space<vmem>>, vector<2x1x9x128xf32>
    %502 = vector.shape_cast %501 : vector<2x1x9x128xf32> to vector<2x9x128xf32>
    %503 = vector.shape_cast %15 : vector<9x128xi1> to vector<1x9x128xi1>
    %504 = vector.broadcast %503 : vector<1x9x128xi1> to vector<2x9x128xi1>
    %505 = arith.select %504, %502, %488 : vector<2x9x128xi1>, vector<2x9x128xf32>
    %c7_i32_300 = arith.constant 7 : i32
    %506 = arith.addi %400, %c7_i32_300 : i32
    %c8_i32_301 = arith.constant 8 : i32
    %c0_i32_302 = arith.constant 0 : i32
    %507 = arith.cmpi eq, %c8_i32_301, %c0_i32_302 : i32
    %c1_i32_303 = arith.constant 1 : i32
    %508 = arith.select %507, %c1_i32_303, %c8_i32_301 : i32
    %509 = arith.remsi %506, %508 : i32
    %c0_i32_304 = arith.constant 0 : i32
    %510 = arith.cmpi ne, %509, %c0_i32_304 : i32
    %c0_i32_305 = arith.constant 0 : i32
    %511 = arith.cmpi slt, %509, %c0_i32_305 : i32
    %c0_i32_306 = arith.constant 0 : i32
    %512 = arith.cmpi slt, %508, %c0_i32_306 : i32
    %513 = arith.xori %511, %512 : i1
    %514 = arith.andi %513, %510 : i1
    %515 = arith.addi %509, %508 : i32
    %516 = arith.select %514, %515, %509 : i32
    %c0_307 = arith.constant 0 : index
    %517 = arith.index_cast %516 : i32 to index
    %c0_308 = arith.constant 0 : index
    %c0_309 = arith.constant 0 : index
    %518 = vector.load %arg3[%c0_307, %517, %c0_308, %c0_309] : memref<2x8x9x128xf32, #tpu.memory_space<vmem>>, vector<2x1x9x128xf32>
    %519 = vector.shape_cast %518 : vector<2x1x9x128xf32> to vector<2x9x128xf32>
    %520 = vector.shape_cast %17 : vector<9x128xi1> to vector<1x9x128xi1>
    %521 = vector.broadcast %520 : vector<1x9x128xi1> to vector<2x9x128xi1>
    %522 = arith.select %521, %519, %505 : vector<2x9x128xi1>, vector<2x9x128xf32>
    %c0_310 = arith.constant 0 : index
    %c3 = arith.constant 3 : index
    %c0_311 = arith.constant 0 : index
    %c0_312 = arith.constant 0 : index
    %523 = vector.load %arg4[%c0_310, %c3, %c0_311, %c0_312] : memref<2x8x9x128xf32, #tpu.memory_space<vmem>>, vector<2x1x9x128xf32>
    %524 = vector.shape_cast %523 : vector<2x1x9x128xf32> to vector<2x9x128xf32>
    %525 = vector.shape_cast %522 : vector<2x9x128xf32> to vector<2x1x9x128xf32>
    tpu.vector_store %arg4[%c0_310, %c3, %c0_311, %c0_312], %525 {strides = array<i32>} : memref<2x8x9x128xf32, #tpu.memory_space<vmem>>, vector<2x1x9x128xf32>,
    %c8_i32_313 = arith.constant 8 : i32
    %526 = arith.muli %arg1, %c8_i32_313 : i32
    %c4_i32_314 = arith.constant 4 : i32
    %527 = arith.addi %526, %c4_i32_314 : i32
    %c0_315 = arith.constant 0 : index
    %528 = arith.index_cast %527 : i32 to index
    %c0_316 = arith.constant 0 : index
    %c0_317 = arith.constant 0 : index
    %529 = vector.load %arg3[%c0_315, %528, %c0_316, %c0_317] : memref<2x8x9x128xf32, #tpu.memory_space<vmem>>, vector<2x1x9x128xf32>
    %530 = vector.shape_cast %529 : vector<2x1x9x128xf32> to vector<2x9x128xf32>
    %c1_i32_318 = arith.constant 1 : i32
    %531 = arith.addi %527, %c1_i32_318 : i32
    %c8_i32_319 = arith.constant 8 : i32
    %c0_i32_320 = arith.constant 0 : i32
    %532 = arith.cmpi eq, %c8_i32_319, %c0_i32_320 : i32
    %c1_i32_321 = arith.constant 1 : i32
    %533 = arith.select %532, %c1_i32_321, %c8_i32_319 : i32
    %534 = arith.remsi %531, %533 : i32
    %c0_i32_322 = arith.constant 0 : i32
    %535 = arith.cmpi ne, %534, %c0_i32_322 : i32
    %c0_i32_323 = arith.constant 0 : i32
    %536 = arith.cmpi slt, %534, %c0_i32_323 : i32
    %c0_i32_324 = arith.constant 0 : i32
    %537 = arith.cmpi slt, %533, %c0_i32_324 : i32
    %538 = arith.xori %536, %537 : i1
    %539 = arith.andi %538, %535 : i1
    %540 = arith.addi %534, %533 : i32
    %541 = arith.select %539, %540, %534 : i32
    %c0_325 = arith.constant 0 : index
    %542 = arith.index_cast %541 : i32 to index
    %c0_326 = arith.constant 0 : index
    %c0_327 = arith.constant 0 : index
    %543 = vector.load %arg3[%c0_325, %542, %c0_326, %c0_327] : memref<2x8x9x128xf32, #tpu.memory_space<vmem>>, vector<2x1x9x128xf32>
    %544 = vector.shape_cast %543 : vector<2x1x9x128xf32> to vector<2x9x128xf32>
    %545 = vector.shape_cast %2 : vector<9x128xi1> to vector<1x9x128xi1>
    %546 = vector.broadcast %545 : vector<1x9x128xi1> to vector<2x9x128xi1>
    %547 = arith.select %546, %544, %530 : vector<2x9x128xi1>, vector<2x9x128xf32>
    %c2_i32_328 = arith.constant 2 : i32
    %548 = arith.addi %527, %c2_i32_328 : i32
    %c8_i32_329 = arith.constant 8 : i32
    %c0_i32_330 = arith.constant 0 : i32
    %549 = arith.cmpi eq, %c8_i32_329, %c0_i32_330 : i32
    %c1_i32_331 = arith.constant 1 : i32
    %550 = arith.select %549, %c1_i32_331, %c8_i32_329 : i32
    %551 = arith.remsi %548, %550 : i32
    %c0_i32_332 = arith.constant 0 : i32
    %552 = arith.cmpi ne, %551, %c0_i32_332 : i32
    %c0_i32_333 = arith.constant 0 : i32
    %553 = arith.cmpi slt, %551, %c0_i32_333 : i32
    %c0_i32_334 = arith.constant 0 : i32
    %554 = arith.cmpi slt, %550, %c0_i32_334 : i32
    %555 = arith.xori %553, %554 : i1
    %556 = arith.andi %555, %552 : i1
    %557 = arith.addi %551, %550 : i32
    %558 = arith.select %556, %557, %551 : i32
    %c0_335 = arith.constant 0 : index
    %559 = arith.index_cast %558 : i32 to index
    %c0_336 = arith.constant 0 : index
    %c0_337 = arith.constant 0 : index
    %560 = vector.load %arg3[%c0_335, %559, %c0_336, %c0_337] : memref<2x8x9x128xf32, #tpu.memory_space<vmem>>, vector<2x1x9x128xf32>
    %561 = vector.shape_cast %560 : vector<2x1x9x128xf32> to vector<2x9x128xf32>
    %562 = vector.shape_cast %4 : vector<9x128xi1> to vector<1x9x128xi1>
    %563 = vector.broadcast %562 : vector<1x9x128xi1> to vector<2x9x128xi1>
    %564 = arith.select %563, %561, %547 : vector<2x9x128xi1>, vector<2x9x128xf32>
    %c3_i32_338 = arith.constant 3 : i32
    %565 = arith.addi %527, %c3_i32_338 : i32
    %c8_i32_339 = arith.constant 8 : i32
    %c0_i32_340 = arith.constant 0 : i32
    %566 = arith.cmpi eq, %c8_i32_339, %c0_i32_340 : i32
    %c1_i32_341 = arith.constant 1 : i32
    %567 = arith.select %566, %c1_i32_341, %c8_i32_339 : i32
    %568 = arith.remsi %565, %567 : i32
    %c0_i32_342 = arith.constant 0 : i32
    %569 = arith.cmpi ne, %568, %c0_i32_342 : i32
    %c0_i32_343 = arith.constant 0 : i32
    %570 = arith.cmpi slt, %568, %c0_i32_343 : i32
    %c0_i32_344 = arith.constant 0 : i32
    %571 = arith.cmpi slt, %567, %c0_i32_344 : i32
    %572 = arith.xori %570, %571 : i1
    %573 = arith.andi %572, %569 : i1
    %574 = arith.addi %568, %567 : i32
    %575 = arith.select %573, %574, %568 : i32
    %c0_345 = arith.constant 0 : index
    %576 = arith.index_cast %575 : i32 to index
    %c0_346 = arith.constant 0 : index
    %c0_347 = arith.constant 0 : index
    %577 = vector.load %arg3[%c0_345, %576, %c0_346, %c0_347] : memref<2x8x9x128xf32, #tpu.memory_space<vmem>>, vector<2x1x9x128xf32>
    %578 = vector.shape_cast %577 : vector<2x1x9x128xf32> to vector<2x9x128xf32>
    %579 = vector.shape_cast %6 : vector<9x128xi1> to vector<1x9x128xi1>
    %580 = vector.broadcast %579 : vector<1x9x128xi1> to vector<2x9x128xi1>
    %581 = arith.select %580, %578, %564 : vector<2x9x128xi1>, vector<2x9x128xf32>
    %c4_i32_348 = arith.constant 4 : i32
    %582 = arith.addi %527, %c4_i32_348 : i32
    %c8_i32_349 = arith.constant 8 : i32
    %c0_i32_350 = arith.constant 0 : i32
    %583 = arith.cmpi eq, %c8_i32_349, %c0_i32_350 : i32
    %c1_i32_351 = arith.constant 1 : i32
    %584 = arith.select %583, %c1_i32_351, %c8_i32_349 : i32
    %585 = arith.remsi %582, %584 : i32
    %c0_i32_352 = arith.constant 0 : i32
    %586 = arith.cmpi ne, %585, %c0_i32_352 : i32
    %c0_i32_353 = arith.constant 0 : i32
    %587 = arith.cmpi slt, %585, %c0_i32_353 : i32
    %c0_i32_354 = arith.constant 0 : i32
    %588 = arith.cmpi slt, %584, %c0_i32_354 : i32
    %589 = arith.xori %587, %588 : i1
    %590 = arith.andi %589, %586 : i1
    %591 = arith.addi %585, %584 : i32
    %592 = arith.select %590, %591, %585 : i32
    %c0_355 = arith.constant 0 : index
    %593 = arith.index_cast %592 : i32 to index
    %c0_356 = arith.constant 0 : index
    %c0_357 = arith.constant 0 : index
    %594 = vector.load %arg3[%c0_355, %593, %c0_356, %c0_357] : memref<2x8x9x128xf32, #tpu.memory_space<vmem>>, vector<2x1x9x128xf32>
    %595 = vector.shape_cast %594 : vector<2x1x9x128xf32> to vector<2x9x128xf32>
    %596 = vector.shape_cast %11 : vector<9x128xi1> to vector<1x9x128xi1>
    %597 = vector.broadcast %596 : vector<1x9x128xi1> to vector<2x9x128xi1>
    %598 = arith.select %597, %595, %581 : vector<2x9x128xi1>, vector<2x9x128xf32>
    %c5_i32_358 = arith.constant 5 : i32
    %599 = arith.addi %527, %c5_i32_358 : i32
    %c8_i32_359 = arith.constant 8 : i32
    %c0_i32_360 = arith.constant 0 : i32
    %600 = arith.cmpi eq, %c8_i32_359, %c0_i32_360 : i32
    %c1_i32_361 = arith.constant 1 : i32
    %601 = arith.select %600, %c1_i32_361, %c8_i32_359 : i32
    %602 = arith.remsi %599, %601 : i32
    %c0_i32_362 = arith.constant 0 : i32
    %603 = arith.cmpi ne, %602, %c0_i32_362 : i32
    %c0_i32_363 = arith.constant 0 : i32
    %604 = arith.cmpi slt, %602, %c0_i32_363 : i32
    %c0_i32_364 = arith.constant 0 : i32
    %605 = arith.cmpi slt, %601, %c0_i32_364 : i32
    %606 = arith.xori %604, %605 : i1
    %607 = arith.andi %606, %603 : i1
    %608 = arith.addi %602, %601 : i32
    %609 = arith.select %607, %608, %602 : i32
    %c0_365 = arith.constant 0 : index
    %610 = arith.index_cast %609 : i32 to index
    %c0_366 = arith.constant 0 : index
    %c0_367 = arith.constant 0 : index
    %611 = vector.load %arg3[%c0_365, %610, %c0_366, %c0_367] : memref<2x8x9x128xf32, #tpu.memory_space<vmem>>, vector<2x1x9x128xf32>
    %612 = vector.shape_cast %611 : vector<2x1x9x128xf32> to vector<2x9x128xf32>
    %613 = vector.shape_cast %13 : vector<9x128xi1> to vector<1x9x128xi1>
    %614 = vector.broadcast %613 : vector<1x9x128xi1> to vector<2x9x128xi1>
    %615 = arith.select %614, %612, %598 : vector<2x9x128xi1>, vector<2x9x128xf32>
    %c6_i32_368 = arith.constant 6 : i32
    %616 = arith.addi %527, %c6_i32_368 : i32
    %c8_i32_369 = arith.constant 8 : i32
    %c0_i32_370 = arith.constant 0 : i32
    %617 = arith.cmpi eq, %c8_i32_369, %c0_i32_370 : i32
    %c1_i32_371 = arith.constant 1 : i32
    %618 = arith.select %617, %c1_i32_371, %c8_i32_369 : i32
    %619 = arith.remsi %616, %618 : i32
    %c0_i32_372 = arith.constant 0 : i32
    %620 = arith.cmpi ne, %619, %c0_i32_372 : i32
    %c0_i32_373 = arith.constant 0 : i32
    %621 = arith.cmpi slt, %619, %c0_i32_373 : i32
    %c0_i32_374 = arith.constant 0 : i32
    %622 = arith.cmpi slt, %618, %c0_i32_374 : i32
    %623 = arith.xori %621, %622 : i1
    %624 = arith.andi %623, %620 : i1
    %625 = arith.addi %619, %618 : i32
    %626 = arith.select %624, %625, %619 : i32
    %c0_375 = arith.constant 0 : index
    %627 = arith.index_cast %626 : i32 to index
    %c0_376 = arith.constant 0 : index
    %c0_377 = arith.constant 0 : index
    %628 = vector.load %arg3[%c0_375, %627, %c0_376, %c0_377] : memref<2x8x9x128xf32, #tpu.memory_space<vmem>>, vector<2x1x9x128xf32>
    %629 = vector.shape_cast %628 : vector<2x1x9x128xf32> to vector<2x9x128xf32>
    %630 = vector.shape_cast %15 : vector<9x128xi1> to vector<1x9x128xi1>
    %631 = vector.broadcast %630 : vector<1x9x128xi1> to vector<2x9x128xi1>
    %632 = arith.select %631, %629, %615 : vector<2x9x128xi1>, vector<2x9x128xf32>
    %c7_i32_378 = arith.constant 7 : i32
    %633 = arith.addi %527, %c7_i32_378 : i32
    %c8_i32_379 = arith.constant 8 : i32
    %c0_i32_380 = arith.constant 0 : i32
    %634 = arith.cmpi eq, %c8_i32_379, %c0_i32_380 : i32
    %c1_i32_381 = arith.constant 1 : i32
    %635 = arith.select %634, %c1_i32_381, %c8_i32_379 : i32
    %636 = arith.remsi %633, %635 : i32
    %c0_i32_382 = arith.constant 0 : i32
    %637 = arith.cmpi ne, %636, %c0_i32_382 : i32
    %c0_i32_383 = arith.constant 0 : i32
    %638 = arith.cmpi slt, %636, %c0_i32_383 : i32
    %c0_i32_384 = arith.constant 0 : i32
    %639 = arith.cmpi slt, %635, %c0_i32_384 : i32
    %640 = arith.xori %638, %639 : i1
    %641 = arith.andi %640, %637 : i1
    %642 = arith.addi %636, %635 : i32
    %643 = arith.select %641, %642, %636 : i32
    %c0_385 = arith.constant 0 : index
    %644 = arith.index_cast %643 : i32 to index
    %c0_386 = arith.constant 0 : index
    %c0_387 = arith.constant 0 : index
    %645 = vector.load %arg3[%c0_385, %644, %c0_386, %c0_387] : memref<2x8x9x128xf32, #tpu.memory_space<vmem>>, vector<2x1x9x128xf32>
    %646 = vector.shape_cast %645 : vector<2x1x9x128xf32> to vector<2x9x128xf32>
    %647 = vector.shape_cast %17 : vector<9x128xi1> to vector<1x9x128xi1>
    %648 = vector.broadcast %647 : vector<1x9x128xi1> to vector<2x9x128xi1>
    %649 = arith.select %648, %646, %632 : vector<2x9x128xi1>, vector<2x9x128xf32>
    %c0_388 = arith.constant 0 : index
    %c4 = arith.constant 4 : index
    %c0_389 = arith.constant 0 : index
    %c0_390 = arith.constant 0 : index
    %650 = vector.load %arg4[%c0_388, %c4, %c0_389, %c0_390] : memref<2x8x9x128xf32, #tpu.memory_space<vmem>>, vector<2x1x9x128xf32>
    %651 = vector.shape_cast %650 : vector<2x1x9x128xf32> to vector<2x9x128xf32>
    %652 = vector.shape_cast %649 : vector<2x9x128xf32> to vector<2x1x9x128xf32>
    tpu.vector_store %arg4[%c0_388, %c4, %c0_389, %c0_390], %652 {strides = array<i32>} : memref<2x8x9x128xf32, #tpu.memory_space<vmem>>, vector<2x1x9x128xf32>,
    %c8_i32_391 = arith.constant 8 : i32
    %653 = arith.muli %arg1, %c8_i32_391 : i32
    %c5_i32_392 = arith.constant 5 : i32
    %654 = arith.addi %653, %c5_i32_392 : i32
    %c0_393 = arith.constant 0 : index
    %655 = arith.index_cast %654 : i32 to index
    %c0_394 = arith.constant 0 : index
    %c0_395 = arith.constant 0 : index
    %656 = vector.load %arg3[%c0_393, %655, %c0_394, %c0_395] : memref<2x8x9x128xf32, #tpu.memory_space<vmem>>, vector<2x1x9x128xf32>
    %657 = vector.shape_cast %656 : vector<2x1x9x128xf32> to vector<2x9x128xf32>
    %c1_i32_396 = arith.constant 1 : i32
    %658 = arith.addi %654, %c1_i32_396 : i32
    %c8_i32_397 = arith.constant 8 : i32
    %c0_i32_398 = arith.constant 0 : i32
    %659 = arith.cmpi eq, %c8_i32_397, %c0_i32_398 : i32
    %c1_i32_399 = arith.constant 1 : i32
    %660 = arith.select %659, %c1_i32_399, %c8_i32_397 : i32
    %661 = arith.remsi %658, %660 : i32
    %c0_i32_400 = arith.constant 0 : i32
    %662 = arith.cmpi ne, %661, %c0_i32_400 : i32
    %c0_i32_401 = arith.constant 0 : i32
    %663 = arith.cmpi slt, %661, %c0_i32_401 : i32
    %c0_i32_402 = arith.constant 0 : i32
    %664 = arith.cmpi slt, %660, %c0_i32_402 : i32
    %665 = arith.xori %663, %664 : i1
    %666 = arith.andi %665, %662 : i1
    %667 = arith.addi %661, %660 : i32
    %668 = arith.select %666, %667, %661 : i32
    %c0_403 = arith.constant 0 : index
    %669 = arith.index_cast %668 : i32 to index
    %c0_404 = arith.constant 0 : index
    %c0_405 = arith.constant 0 : index
    %670 = vector.load %arg3[%c0_403, %669, %c0_404, %c0_405] : memref<2x8x9x128xf32, #tpu.memory_space<vmem>>, vector<2x1x9x128xf32>
    %671 = vector.shape_cast %670 : vector<2x1x9x128xf32> to vector<2x9x128xf32>
    %672 = vector.shape_cast %2 : vector<9x128xi1> to vector<1x9x128xi1>
    %673 = vector.broadcast %672 : vector<1x9x128xi1> to vector<2x9x128xi1>
    %674 = arith.select %673, %671, %657 : vector<2x9x128xi1>, vector<2x9x128xf32>
    %c2_i32_406 = arith.constant 2 : i32
    %675 = arith.addi %654, %c2_i32_406 : i32
    %c8_i32_407 = arith.constant 8 : i32
    %c0_i32_408 = arith.constant 0 : i32
    %676 = arith.cmpi eq, %c8_i32_407, %c0_i32_408 : i32
    %c1_i32_409 = arith.constant 1 : i32
    %677 = arith.select %676, %c1_i32_409, %c8_i32_407 : i32
    %678 = arith.remsi %675, %677 : i32
    %c0_i32_410 = arith.constant 0 : i32
    %679 = arith.cmpi ne, %678, %c0_i32_410 : i32
    %c0_i32_411 = arith.constant 0 : i32
    %680 = arith.cmpi slt, %678, %c0_i32_411 : i32
    %c0_i32_412 = arith.constant 0 : i32
    %681 = arith.cmpi slt, %677, %c0_i32_412 : i32
    %682 = arith.xori %680, %681 : i1
    %683 = arith.andi %682, %679 : i1
    %684 = arith.addi %678, %677 : i32
    %685 = arith.select %683, %684, %678 : i32
    %c0_413 = arith.constant 0 : index
    %686 = arith.index_cast %685 : i32 to index
    %c0_414 = arith.constant 0 : index
    %c0_415 = arith.constant 0 : index
    %687 = vector.load %arg3[%c0_413, %686, %c0_414, %c0_415] : memref<2x8x9x128xf32, #tpu.memory_space<vmem>>, vector<2x1x9x128xf32>
    %688 = vector.shape_cast %687 : vector<2x1x9x128xf32> to vector<2x9x128xf32>
    %689 = vector.shape_cast %4 : vector<9x128xi1> to vector<1x9x128xi1>
    %690 = vector.broadcast %689 : vector<1x9x128xi1> to vector<2x9x128xi1>
    %691 = arith.select %690, %688, %674 : vector<2x9x128xi1>, vector<2x9x128xf32>
    %c3_i32_416 = arith.constant 3 : i32
    %692 = arith.addi %654, %c3_i32_416 : i32
    %c8_i32_417 = arith.constant 8 : i32
    %c0_i32_418 = arith.constant 0 : i32
    %693 = arith.cmpi eq, %c8_i32_417, %c0_i32_418 : i32
    %c1_i32_419 = arith.constant 1 : i32
    %694 = arith.select %693, %c1_i32_419, %c8_i32_417 : i32
    %695 = arith.remsi %692, %694 : i32
    %c0_i32_420 = arith.constant 0 : i32
    %696 = arith.cmpi ne, %695, %c0_i32_420 : i32
    %c0_i32_421 = arith.constant 0 : i32
    %697 = arith.cmpi slt, %695, %c0_i32_421 : i32
    %c0_i32_422 = arith.constant 0 : i32
    %698 = arith.cmpi slt, %694, %c0_i32_422 : i32
    %699 = arith.xori %697, %698 : i1
    %700 = arith.andi %699, %696 : i1
    %701 = arith.addi %695, %694 : i32
    %702 = arith.select %700, %701, %695 : i32
    %c0_423 = arith.constant 0 : index
    %703 = arith.index_cast %702 : i32 to index
    %c0_424 = arith.constant 0 : index
    %c0_425 = arith.constant 0 : index
    %704 = vector.load %arg3[%c0_423, %703, %c0_424, %c0_425] : memref<2x8x9x128xf32, #tpu.memory_space<vmem>>, vector<2x1x9x128xf32>
    %705 = vector.shape_cast %704 : vector<2x1x9x128xf32> to vector<2x9x128xf32>
    %706 = vector.shape_cast %6 : vector<9x128xi1> to vector<1x9x128xi1>
    %707 = vector.broadcast %706 : vector<1x9x128xi1> to vector<2x9x128xi1>
    %708 = arith.select %707, %705, %691 : vector<2x9x128xi1>, vector<2x9x128xf32>
    %c4_i32_426 = arith.constant 4 : i32
    %709 = arith.addi %654, %c4_i32_426 : i32
    %c8_i32_427 = arith.constant 8 : i32
    %c0_i32_428 = arith.constant 0 : i32
    %710 = arith.cmpi eq, %c8_i32_427, %c0_i32_428 : i32
    %c1_i32_429 = arith.constant 1 : i32
    %711 = arith.select %710, %c1_i32_429, %c8_i32_427 : i32
    %712 = arith.remsi %709, %711 : i32
    %c0_i32_430 = arith.constant 0 : i32
    %713 = arith.cmpi ne, %712, %c0_i32_430 : i32
    %c0_i32_431 = arith.constant 0 : i32
    %714 = arith.cmpi slt, %712, %c0_i32_431 : i32
    %c0_i32_432 = arith.constant 0 : i32
    %715 = arith.cmpi slt, %711, %c0_i32_432 : i32
    %716 = arith.xori %714, %715 : i1
    %717 = arith.andi %716, %713 : i1
    %718 = arith.addi %712, %711 : i32
    %719 = arith.select %717, %718, %712 : i32
    %c0_433 = arith.constant 0 : index
    %720 = arith.index_cast %719 : i32 to index
    %c0_434 = arith.constant 0 : index
    %c0_435 = arith.constant 0 : index
    %721 = vector.load %arg3[%c0_433, %720, %c0_434, %c0_435] : memref<2x8x9x128xf32, #tpu.memory_space<vmem>>, vector<2x1x9x128xf32>
    %722 = vector.shape_cast %721 : vector<2x1x9x128xf32> to vector<2x9x128xf32>
    %723 = vector.shape_cast %11 : vector<9x128xi1> to vector<1x9x128xi1>
    %724 = vector.broadcast %723 : vector<1x9x128xi1> to vector<2x9x128xi1>
    %725 = arith.select %724, %722, %708 : vector<2x9x128xi1>, vector<2x9x128xf32>
    %c5_i32_436 = arith.constant 5 : i32
    %726 = arith.addi %654, %c5_i32_436 : i32
    %c8_i32_437 = arith.constant 8 : i32
    %c0_i32_438 = arith.constant 0 : i32
    %727 = arith.cmpi eq, %c8_i32_437, %c0_i32_438 : i32
    %c1_i32_439 = arith.constant 1 : i32
    %728 = arith.select %727, %c1_i32_439, %c8_i32_437 : i32
    %729 = arith.remsi %726, %728 : i32
    %c0_i32_440 = arith.constant 0 : i32
    %730 = arith.cmpi ne, %729, %c0_i32_440 : i32
    %c0_i32_441 = arith.constant 0 : i32
    %731 = arith.cmpi slt, %729, %c0_i32_441 : i32
    %c0_i32_442 = arith.constant 0 : i32
    %732 = arith.cmpi slt, %728, %c0_i32_442 : i32
    %733 = arith.xori %731, %732 : i1
    %734 = arith.andi %733, %730 : i1
    %735 = arith.addi %729, %728 : i32
    %736 = arith.select %734, %735, %729 : i32
    %c0_443 = arith.constant 0 : index
    %737 = arith.index_cast %736 : i32 to index
    %c0_444 = arith.constant 0 : index
    %c0_445 = arith.constant 0 : index
    %738 = vector.load %arg3[%c0_443, %737, %c0_444, %c0_445] : memref<2x8x9x128xf32, #tpu.memory_space<vmem>>, vector<2x1x9x128xf32>
    %739 = vector.shape_cast %738 : vector<2x1x9x128xf32> to vector<2x9x128xf32>
    %740 = vector.shape_cast %13 : vector<9x128xi1> to vector<1x9x128xi1>
    %741 = vector.broadcast %740 : vector<1x9x128xi1> to vector<2x9x128xi1>
    %742 = arith.select %741, %739, %725 : vector<2x9x128xi1>, vector<2x9x128xf32>
    %c6_i32_446 = arith.constant 6 : i32
    %743 = arith.addi %654, %c6_i32_446 : i32
    %c8_i32_447 = arith.constant 8 : i32
    %c0_i32_448 = arith.constant 0 : i32
    %744 = arith.cmpi eq, %c8_i32_447, %c0_i32_448 : i32
    %c1_i32_449 = arith.constant 1 : i32
    %745 = arith.select %744, %c1_i32_449, %c8_i32_447 : i32
    %746 = arith.remsi %743, %745 : i32
    %c0_i32_450 = arith.constant 0 : i32
    %747 = arith.cmpi ne, %746, %c0_i32_450 : i32
    %c0_i32_451 = arith.constant 0 : i32
    %748 = arith.cmpi slt, %746, %c0_i32_451 : i32
    %c0_i32_452 = arith.constant 0 : i32
    %749 = arith.cmpi slt, %745, %c0_i32_452 : i32
    %750 = arith.xori %748, %749 : i1
    %751 = arith.andi %750, %747 : i1
    %752 = arith.addi %746, %745 : i32
    %753 = arith.select %751, %752, %746 : i32
    %c0_453 = arith.constant 0 : index
    %754 = arith.index_cast %753 : i32 to index
    %c0_454 = arith.constant 0 : index
    %c0_455 = arith.constant 0 : index
    %755 = vector.load %arg3[%c0_453, %754, %c0_454, %c0_455] : memref<2x8x9x128xf32, #tpu.memory_space<vmem>>, vector<2x1x9x128xf32>
    %756 = vector.shape_cast %755 : vector<2x1x9x128xf32> to vector<2x9x128xf32>
    %757 = vector.shape_cast %15 : vector<9x128xi1> to vector<1x9x128xi1>
    %758 = vector.broadcast %757 : vector<1x9x128xi1> to vector<2x9x128xi1>
    %759 = arith.select %758, %756, %742 : vector<2x9x128xi1>, vector<2x9x128xf32>
    %c7_i32_456 = arith.constant 7 : i32
    %760 = arith.addi %654, %c7_i32_456 : i32
    %c8_i32_457 = arith.constant 8 : i32
    %c0_i32_458 = arith.constant 0 : i32
    %761 = arith.cmpi eq, %c8_i32_457, %c0_i32_458 : i32
    %c1_i32_459 = arith.constant 1 : i32
    %762 = arith.select %761, %c1_i32_459, %c8_i32_457 : i32
    %763 = arith.remsi %760, %762 : i32
    %c0_i32_460 = arith.constant 0 : i32
    %764 = arith.cmpi ne, %763, %c0_i32_460 : i32
    %c0_i32_461 = arith.constant 0 : i32
    %765 = arith.cmpi slt, %763, %c0_i32_461 : i32
    %c0_i32_462 = arith.constant 0 : i32
    %766 = arith.cmpi slt, %762, %c0_i32_462 : i32
    %767 = arith.xori %765, %766 : i1
    %768 = arith.andi %767, %764 : i1
    %769 = arith.addi %763, %762 : i32
    %770 = arith.select %768, %769, %763 : i32
    %c0_463 = arith.constant 0 : index
    %771 = arith.index_cast %770 : i32 to index
    %c0_464 = arith.constant 0 : index
    %c0_465 = arith.constant 0 : index
    %772 = vector.load %arg3[%c0_463, %771, %c0_464, %c0_465] : memref<2x8x9x128xf32, #tpu.memory_space<vmem>>, vector<2x1x9x128xf32>
    %773 = vector.shape_cast %772 : vector<2x1x9x128xf32> to vector<2x9x128xf32>
    %774 = vector.shape_cast %17 : vector<9x128xi1> to vector<1x9x128xi1>
    %775 = vector.broadcast %774 : vector<1x9x128xi1> to vector<2x9x128xi1>
    %776 = arith.select %775, %773, %759 : vector<2x9x128xi1>, vector<2x9x128xf32>
    %c0_466 = arith.constant 0 : index
    %c5 = arith.constant 5 : index
    %c0_467 = arith.constant 0 : index
    %c0_468 = arith.constant 0 : index
    %777 = vector.load %arg4[%c0_466, %c5, %c0_467, %c0_468] : memref<2x8x9x128xf32, #tpu.memory_space<vmem>>, vector<2x1x9x128xf32>
    %778 = vector.shape_cast %777 : vector<2x1x9x128xf32> to vector<2x9x128xf32>
    %779 = vector.shape_cast %776 : vector<2x9x128xf32> to vector<2x1x9x128xf32>
    tpu.vector_store %arg4[%c0_466, %c5, %c0_467, %c0_468], %779 {strides = array<i32>} : memref<2x8x9x128xf32, #tpu.memory_space<vmem>>, vector<2x1x9x128xf32>,
    %c8_i32_469 = arith.constant 8 : i32
    %780 = arith.muli %arg1, %c8_i32_469 : i32
    %c6_i32_470 = arith.constant 6 : i32
    %781 = arith.addi %780, %c6_i32_470 : i32
    %c0_471 = arith.constant 0 : index
    %782 = arith.index_cast %781 : i32 to index
    %c0_472 = arith.constant 0 : index
    %c0_473 = arith.constant 0 : index
    %783 = vector.load %arg3[%c0_471, %782, %c0_472, %c0_473] : memref<2x8x9x128xf32, #tpu.memory_space<vmem>>, vector<2x1x9x128xf32>
    %784 = vector.shape_cast %783 : vector<2x1x9x128xf32> to vector<2x9x128xf32>
    %c1_i32_474 = arith.constant 1 : i32
    %785 = arith.addi %781, %c1_i32_474 : i32
    %c8_i32_475 = arith.constant 8 : i32
    %c0_i32_476 = arith.constant 0 : i32
    %786 = arith.cmpi eq, %c8_i32_475, %c0_i32_476 : i32
    %c1_i32_477 = arith.constant 1 : i32
    %787 = arith.select %786, %c1_i32_477, %c8_i32_475 : i32
    %788 = arith.remsi %785, %787 : i32
    %c0_i32_478 = arith.constant 0 : i32
    %789 = arith.cmpi ne, %788, %c0_i32_478 : i32
    %c0_i32_479 = arith.constant 0 : i32
    %790 = arith.cmpi slt, %788, %c0_i32_479 : i32
    %c0_i32_480 = arith.constant 0 : i32
    %791 = arith.cmpi slt, %787, %c0_i32_480 : i32
    %792 = arith.xori %790, %791 : i1
    %793 = arith.andi %792, %789 : i1
    %794 = arith.addi %788, %787 : i32
    %795 = arith.select %793, %794, %788 : i32
    %c0_481 = arith.constant 0 : index
    %796 = arith.index_cast %795 : i32 to index
    %c0_482 = arith.constant 0 : index
    %c0_483 = arith.constant 0 : index
    %797 = vector.load %arg3[%c0_481, %796, %c0_482, %c0_483] : memref<2x8x9x128xf32, #tpu.memory_space<vmem>>, vector<2x1x9x128xf32>
    %798 = vector.shape_cast %797 : vector<2x1x9x128xf32> to vector<2x9x128xf32>
    %799 = vector.shape_cast %2 : vector<9x128xi1> to vector<1x9x128xi1>
    %800 = vector.broadcast %799 : vector<1x9x128xi1> to vector<2x9x128xi1>
    %801 = arith.select %800, %798, %784 : vector<2x9x128xi1>, vector<2x9x128xf32>
    %c2_i32_484 = arith.constant 2 : i32
    %802 = arith.addi %781, %c2_i32_484 : i32
    %c8_i32_485 = arith.constant 8 : i32
    %c0_i32_486 = arith.constant 0 : i32
    %803 = arith.cmpi eq, %c8_i32_485, %c0_i32_486 : i32
    %c1_i32_487 = arith.constant 1 : i32
    %804 = arith.select %803, %c1_i32_487, %c8_i32_485 : i32
    %805 = arith.remsi %802, %804 : i32
    %c0_i32_488 = arith.constant 0 : i32
    %806 = arith.cmpi ne, %805, %c0_i32_488 : i32
    %c0_i32_489 = arith.constant 0 : i32
    %807 = arith.cmpi slt, %805, %c0_i32_489 : i32
    %c0_i32_490 = arith.constant 0 : i32
    %808 = arith.cmpi slt, %804, %c0_i32_490 : i32
    %809 = arith.xori %807, %808 : i1
    %810 = arith.andi %809, %806 : i1
    %811 = arith.addi %805, %804 : i32
    %812 = arith.select %810, %811, %805 : i32
    %c0_491 = arith.constant 0 : index
    %813 = arith.index_cast %812 : i32 to index
    %c0_492 = arith.constant 0 : index
    %c0_493 = arith.constant 0 : index
    %814 = vector.load %arg3[%c0_491, %813, %c0_492, %c0_493] : memref<2x8x9x128xf32, #tpu.memory_space<vmem>>, vector<2x1x9x128xf32>
    %815 = vector.shape_cast %814 : vector<2x1x9x128xf32> to vector<2x9x128xf32>
    %816 = vector.shape_cast %4 : vector<9x128xi1> to vector<1x9x128xi1>
    %817 = vector.broadcast %816 : vector<1x9x128xi1> to vector<2x9x128xi1>
    %818 = arith.select %817, %815, %801 : vector<2x9x128xi1>, vector<2x9x128xf32>
    %c3_i32_494 = arith.constant 3 : i32
    %819 = arith.addi %781, %c3_i32_494 : i32
    %c8_i32_495 = arith.constant 8 : i32
    %c0_i32_496 = arith.constant 0 : i32
    %820 = arith.cmpi eq, %c8_i32_495, %c0_i32_496 : i32
    %c1_i32_497 = arith.constant 1 : i32
    %821 = arith.select %820, %c1_i32_497, %c8_i32_495 : i32
    %822 = arith.remsi %819, %821 : i32
    %c0_i32_498 = arith.constant 0 : i32
    %823 = arith.cmpi ne, %822, %c0_i32_498 : i32
    %c0_i32_499 = arith.constant 0 : i32
    %824 = arith.cmpi slt, %822, %c0_i32_499 : i32
    %c0_i32_500 = arith.constant 0 : i32
    %825 = arith.cmpi slt, %821, %c0_i32_500 : i32
    %826 = arith.xori %824, %825 : i1
    %827 = arith.andi %826, %823 : i1
    %828 = arith.addi %822, %821 : i32
    %829 = arith.select %827, %828, %822 : i32
    %c0_501 = arith.constant 0 : index
    %830 = arith.index_cast %829 : i32 to index
    %c0_502 = arith.constant 0 : index
    %c0_503 = arith.constant 0 : index
    %831 = vector.load %arg3[%c0_501, %830, %c0_502, %c0_503] : memref<2x8x9x128xf32, #tpu.memory_space<vmem>>, vector<2x1x9x128xf32>
    %832 = vector.shape_cast %831 : vector<2x1x9x128xf32> to vector<2x9x128xf32>
    %833 = vector.shape_cast %6 : vector<9x128xi1> to vector<1x9x128xi1>
    %834 = vector.broadcast %833 : vector<1x9x128xi1> to vector<2x9x128xi1>
    %835 = arith.select %834, %832, %818 : vector<2x9x128xi1>, vector<2x9x128xf32>
    %c4_i32_504 = arith.constant 4 : i32
    %836 = arith.addi %781, %c4_i32_504 : i32
    %c8_i32_505 = arith.constant 8 : i32
    %c0_i32_506 = arith.constant 0 : i32
    %837 = arith.cmpi eq, %c8_i32_505, %c0_i32_506 : i32
    %c1_i32_507 = arith.constant 1 : i32
    %838 = arith.select %837, %c1_i32_507, %c8_i32_505 : i32
    %839 = arith.remsi %836, %838 : i32
    %c0_i32_508 = arith.constant 0 : i32
    %840 = arith.cmpi ne, %839, %c0_i32_508 : i32
    %c0_i32_509 = arith.constant 0 : i32
    %841 = arith.cmpi slt, %839, %c0_i32_509 : i32
    %c0_i32_510 = arith.constant 0 : i32
    %842 = arith.cmpi slt, %838, %c0_i32_510 : i32
    %843 = arith.xori %841, %842 : i1
    %844 = arith.andi %843, %840 : i1
    %845 = arith.addi %839, %838 : i32
    %846 = arith.select %844, %845, %839 : i32
    %c0_511 = arith.constant 0 : index
    %847 = arith.index_cast %846 : i32 to index
    %c0_512 = arith.constant 0 : index
    %c0_513 = arith.constant 0 : index
    %848 = vector.load %arg3[%c0_511, %847, %c0_512, %c0_513] : memref<2x8x9x128xf32, #tpu.memory_space<vmem>>, vector<2x1x9x128xf32>
    %849 = vector.shape_cast %848 : vector<2x1x9x128xf32> to vector<2x9x128xf32>
    %850 = vector.shape_cast %11 : vector<9x128xi1> to vector<1x9x128xi1>
    %851 = vector.broadcast %850 : vector<1x9x128xi1> to vector<2x9x128xi1>
    %852 = arith.select %851, %849, %835 : vector<2x9x128xi1>, vector<2x9x128xf32>
    %c5_i32_514 = arith.constant 5 : i32
    %853 = arith.addi %781, %c5_i32_514 : i32
    %c8_i32_515 = arith.constant 8 : i32
    %c0_i32_516 = arith.constant 0 : i32
    %854 = arith.cmpi eq, %c8_i32_515, %c0_i32_516 : i32
    %c1_i32_517 = arith.constant 1 : i32
    %855 = arith.select %854, %c1_i32_517, %c8_i32_515 : i32
    %856 = arith.remsi %853, %855 : i32
    %c0_i32_518 = arith.constant 0 : i32
    %857 = arith.cmpi ne, %856, %c0_i32_518 : i32
    %c0_i32_519 = arith.constant 0 : i32
    %858 = arith.cmpi slt, %856, %c0_i32_519 : i32
    %c0_i32_520 = arith.constant 0 : i32
    %859 = arith.cmpi slt, %855, %c0_i32_520 : i32
    %860 = arith.xori %858, %859 : i1
    %861 = arith.andi %860, %857 : i1
    %862 = arith.addi %856, %855 : i32
    %863 = arith.select %861, %862, %856 : i32
    %c0_521 = arith.constant 0 : index
    %864 = arith.index_cast %863 : i32 to index
    %c0_522 = arith.constant 0 : index
    %c0_523 = arith.constant 0 : index
    %865 = vector.load %arg3[%c0_521, %864, %c0_522, %c0_523] : memref<2x8x9x128xf32, #tpu.memory_space<vmem>>, vector<2x1x9x128xf32>
    %866 = vector.shape_cast %865 : vector<2x1x9x128xf32> to vector<2x9x128xf32>
    %867 = vector.shape_cast %13 : vector<9x128xi1> to vector<1x9x128xi1>
    %868 = vector.broadcast %867 : vector<1x9x128xi1> to vector<2x9x128xi1>
    %869 = arith.select %868, %866, %852 : vector<2x9x128xi1>, vector<2x9x128xf32>
    %c6_i32_524 = arith.constant 6 : i32
    %870 = arith.addi %781, %c6_i32_524 : i32
    %c8_i32_525 = arith.constant 8 : i32
    %c0_i32_526 = arith.constant 0 : i32
    %871 = arith.cmpi eq, %c8_i32_525, %c0_i32_526 : i32
    %c1_i32_527 = arith.constant 1 : i32
    %872 = arith.select %871, %c1_i32_527, %c8_i32_525 : i32
    %873 = arith.remsi %870, %872 : i32
    %c0_i32_528 = arith.constant 0 : i32
    %874 = arith.cmpi ne, %873, %c0_i32_528 : i32
    %c0_i32_529 = arith.constant 0 : i32
    %875 = arith.cmpi slt, %873, %c0_i32_529 : i32
    %c0_i32_530 = arith.constant 0 : i32
    %876 = arith.cmpi slt, %872, %c0_i32_530 : i32
    %877 = arith.xori %875, %876 : i1
    %878 = arith.andi %877, %874 : i1
    %879 = arith.addi %873, %872 : i32
    %880 = arith.select %878, %879, %873 : i32
    %c0_531 = arith.constant 0 : index
    %881 = arith.index_cast %880 : i32 to index
    %c0_532 = arith.constant 0 : index
    %c0_533 = arith.constant 0 : index
    %882 = vector.load %arg3[%c0_531, %881, %c0_532, %c0_533] : memref<2x8x9x128xf32, #tpu.memory_space<vmem>>, vector<2x1x9x128xf32>
    %883 = vector.shape_cast %882 : vector<2x1x9x128xf32> to vector<2x9x128xf32>
    %884 = vector.shape_cast %15 : vector<9x128xi1> to vector<1x9x128xi1>
    %885 = vector.broadcast %884 : vector<1x9x128xi1> to vector<2x9x128xi1>
    %886 = arith.select %885, %883, %869 : vector<2x9x128xi1>, vector<2x9x128xf32>
    %c7_i32_534 = arith.constant 7 : i32
    %887 = arith.addi %781, %c7_i32_534 : i32
    %c8_i32_535 = arith.constant 8 : i32
    %c0_i32_536 = arith.constant 0 : i32
    %888 = arith.cmpi eq, %c8_i32_535, %c0_i32_536 : i32
    %c1_i32_537 = arith.constant 1 : i32
    %889 = arith.select %888, %c1_i32_537, %c8_i32_535 : i32
    %890 = arith.remsi %887, %889 : i32
    %c0_i32_538 = arith.constant 0 : i32
    %891 = arith.cmpi ne, %890, %c0_i32_538 : i32
    %c0_i32_539 = arith.constant 0 : i32
    %892 = arith.cmpi slt, %890, %c0_i32_539 : i32
    %c0_i32_540 = arith.constant 0 : i32
    %893 = arith.cmpi slt, %889, %c0_i32_540 : i32
    %894 = arith.xori %892, %893 : i1
    %895 = arith.andi %894, %891 : i1
    %896 = arith.addi %890, %889 : i32
    %897 = arith.select %895, %896, %890 : i32
    %c0_541 = arith.constant 0 : index
    %898 = arith.index_cast %897 : i32 to index
    %c0_542 = arith.constant 0 : index
    %c0_543 = arith.constant 0 : index
    %899 = vector.load %arg3[%c0_541, %898, %c0_542, %c0_543] : memref<2x8x9x128xf32, #tpu.memory_space<vmem>>, vector<2x1x9x128xf32>
    %900 = vector.shape_cast %899 : vector<2x1x9x128xf32> to vector<2x9x128xf32>
    %901 = vector.shape_cast %17 : vector<9x128xi1> to vector<1x9x128xi1>
    %902 = vector.broadcast %901 : vector<1x9x128xi1> to vector<2x9x128xi1>
    %903 = arith.select %902, %900, %886 : vector<2x9x128xi1>, vector<2x9x128xf32>
    %c0_544 = arith.constant 0 : index
    %c6 = arith.constant 6 : index
    %c0_545 = arith.constant 0 : index
    %c0_546 = arith.constant 0 : index
    %904 = vector.load %arg4[%c0_544, %c6, %c0_545, %c0_546] : memref<2x8x9x128xf32, #tpu.memory_space<vmem>>, vector<2x1x9x128xf32>
    %905 = vector.shape_cast %904 : vector<2x1x9x128xf32> to vector<2x9x128xf32>
    %906 = vector.shape_cast %903 : vector<2x9x128xf32> to vector<2x1x9x128xf32>
    tpu.vector_store %arg4[%c0_544, %c6, %c0_545, %c0_546], %906 {strides = array<i32>} : memref<2x8x9x128xf32, #tpu.memory_space<vmem>>, vector<2x1x9x128xf32>,
    %c8_i32_547 = arith.constant 8 : i32
    %907 = arith.muli %arg1, %c8_i32_547 : i32
    %c7_i32_548 = arith.constant 7 : i32
    %908 = arith.addi %907, %c7_i32_548 : i32
    %c0_549 = arith.constant 0 : index
    %909 = arith.index_cast %908 : i32 to index
    %c0_550 = arith.constant 0 : index
    %c0_551 = arith.constant 0 : index
    %910 = vector.load %arg3[%c0_549, %909, %c0_550, %c0_551] : memref<2x8x9x128xf32, #tpu.memory_space<vmem>>, vector<2x1x9x128xf32>
    %911 = vector.shape_cast %910 : vector<2x1x9x128xf32> to vector<2x9x128xf32>
    %c1_i32_552 = arith.constant 1 : i32
    %912 = arith.addi %908, %c1_i32_552 : i32
    %c8_i32_553 = arith.constant 8 : i32
    %c0_i32_554 = arith.constant 0 : i32
    %913 = arith.cmpi eq, %c8_i32_553, %c0_i32_554 : i32
    %c1_i32_555 = arith.constant 1 : i32
    %914 = arith.select %913, %c1_i32_555, %c8_i32_553 : i32
    %915 = arith.remsi %912, %914 : i32
    %c0_i32_556 = arith.constant 0 : i32
    %916 = arith.cmpi ne, %915, %c0_i32_556 : i32
    %c0_i32_557 = arith.constant 0 : i32
    %917 = arith.cmpi slt, %915, %c0_i32_557 : i32
    %c0_i32_558 = arith.constant 0 : i32
    %918 = arith.cmpi slt, %914, %c0_i32_558 : i32
    %919 = arith.xori %917, %918 : i1
    %920 = arith.andi %919, %916 : i1
    %921 = arith.addi %915, %914 : i32
    %922 = arith.select %920, %921, %915 : i32
    %c0_559 = arith.constant 0 : index
    %923 = arith.index_cast %922 : i32 to index
    %c0_560 = arith.constant 0 : index
    %c0_561 = arith.constant 0 : index
    %924 = vector.load %arg3[%c0_559, %923, %c0_560, %c0_561] : memref<2x8x9x128xf32, #tpu.memory_space<vmem>>, vector<2x1x9x128xf32>
    %925 = vector.shape_cast %924 : vector<2x1x9x128xf32> to vector<2x9x128xf32>
    %926 = vector.shape_cast %2 : vector<9x128xi1> to vector<1x9x128xi1>
    %927 = vector.broadcast %926 : vector<1x9x128xi1> to vector<2x9x128xi1>
    %928 = arith.select %927, %925, %911 : vector<2x9x128xi1>, vector<2x9x128xf32>
    %c2_i32_562 = arith.constant 2 : i32
    %929 = arith.addi %908, %c2_i32_562 : i32
    %c8_i32_563 = arith.constant 8 : i32
    %c0_i32_564 = arith.constant 0 : i32
    %930 = arith.cmpi eq, %c8_i32_563, %c0_i32_564 : i32
    %c1_i32_565 = arith.constant 1 : i32
    %931 = arith.select %930, %c1_i32_565, %c8_i32_563 : i32
    %932 = arith.remsi %929, %931 : i32
    %c0_i32_566 = arith.constant 0 : i32
    %933 = arith.cmpi ne, %932, %c0_i32_566 : i32
    %c0_i32_567 = arith.constant 0 : i32
    %934 = arith.cmpi slt, %932, %c0_i32_567 : i32
    %c0_i32_568 = arith.constant 0 : i32
    %935 = arith.cmpi slt, %931, %c0_i32_568 : i32
    %936 = arith.xori %934, %935 : i1
    %937 = arith.andi %936, %933 : i1
    %938 = arith.addi %932, %931 : i32
    %939 = arith.select %937, %938, %932 : i32
    %c0_569 = arith.constant 0 : index
    %940 = arith.index_cast %939 : i32 to index
    %c0_570 = arith.constant 0 : index
    %c0_571 = arith.constant 0 : index
    %941 = vector.load %arg3[%c0_569, %940, %c0_570, %c0_571] : memref<2x8x9x128xf32, #tpu.memory_space<vmem>>, vector<2x1x9x128xf32>
    %942 = vector.shape_cast %941 : vector<2x1x9x128xf32> to vector<2x9x128xf32>
    %943 = vector.shape_cast %4 : vector<9x128xi1> to vector<1x9x128xi1>
    %944 = vector.broadcast %943 : vector<1x9x128xi1> to vector<2x9x128xi1>
    %945 = arith.select %944, %942, %928 : vector<2x9x128xi1>, vector<2x9x128xf32>
    %c3_i32_572 = arith.constant 3 : i32
    %946 = arith.addi %908, %c3_i32_572 : i32
    %c8_i32_573 = arith.constant 8 : i32
    %c0_i32_574 = arith.constant 0 : i32
    %947 = arith.cmpi eq, %c8_i32_573, %c0_i32_574 : i32
    %c1_i32_575 = arith.constant 1 : i32
    %948 = arith.select %947, %c1_i32_575, %c8_i32_573 : i32
    %949 = arith.remsi %946, %948 : i32
    %c0_i32_576 = arith.constant 0 : i32
    %950 = arith.cmpi ne, %949, %c0_i32_576 : i32
    %c0_i32_577 = arith.constant 0 : i32
    %951 = arith.cmpi slt, %949, %c0_i32_577 : i32
    %c0_i32_578 = arith.constant 0 : i32
    %952 = arith.cmpi slt, %948, %c0_i32_578 : i32
    %953 = arith.xori %951, %952 : i1
    %954 = arith.andi %953, %950 : i1
    %955 = arith.addi %949, %948 : i32
    %956 = arith.select %954, %955, %949 : i32
    %c0_579 = arith.constant 0 : index
    %957 = arith.index_cast %956 : i32 to index
    %c0_580 = arith.constant 0 : index
    %c0_581 = arith.constant 0 : index
    %958 = vector.load %arg3[%c0_579, %957, %c0_580, %c0_581] : memref<2x8x9x128xf32, #tpu.memory_space<vmem>>, vector<2x1x9x128xf32>
    %959 = vector.shape_cast %958 : vector<2x1x9x128xf32> to vector<2x9x128xf32>
    %960 = vector.shape_cast %6 : vector<9x128xi1> to vector<1x9x128xi1>
    %961 = vector.broadcast %960 : vector<1x9x128xi1> to vector<2x9x128xi1>
    %962 = arith.select %961, %959, %945 : vector<2x9x128xi1>, vector<2x9x128xf32>
    %c4_i32_582 = arith.constant 4 : i32
    %963 = arith.addi %908, %c4_i32_582 : i32
    %c8_i32_583 = arith.constant 8 : i32
    %c0_i32_584 = arith.constant 0 : i32
    %964 = arith.cmpi eq, %c8_i32_583, %c0_i32_584 : i32
    %c1_i32_585 = arith.constant 1 : i32
    %965 = arith.select %964, %c1_i32_585, %c8_i32_583 : i32
    %966 = arith.remsi %963, %965 : i32
    %c0_i32_586 = arith.constant 0 : i32
    %967 = arith.cmpi ne, %966, %c0_i32_586 : i32
    %c0_i32_587 = arith.constant 0 : i32
    %968 = arith.cmpi slt, %966, %c0_i32_587 : i32
    %c0_i32_588 = arith.constant 0 : i32
    %969 = arith.cmpi slt, %965, %c0_i32_588 : i32
    %970 = arith.xori %968, %969 : i1
    %971 = arith.andi %970, %967 : i1
    %972 = arith.addi %966, %965 : i32
    %973 = arith.select %971, %972, %966 : i32
    %c0_589 = arith.constant 0 : index
    %974 = arith.index_cast %973 : i32 to index
    %c0_590 = arith.constant 0 : index
    %c0_591 = arith.constant 0 : index
    %975 = vector.load %arg3[%c0_589, %974, %c0_590, %c0_591] : memref<2x8x9x128xf32, #tpu.memory_space<vmem>>, vector<2x1x9x128xf32>
    %976 = vector.shape_cast %975 : vector<2x1x9x128xf32> to vector<2x9x128xf32>
    %977 = vector.shape_cast %11 : vector<9x128xi1> to vector<1x9x128xi1>
    %978 = vector.broadcast %977 : vector<1x9x128xi1> to vector<2x9x128xi1>
    %979 = arith.select %978, %976, %962 : vector<2x9x128xi1>, vector<2x9x128xf32>
    %c5_i32_592 = arith.constant 5 : i32
    %980 = arith.addi %908, %c5_i32_592 : i32
    %c8_i32_593 = arith.constant 8 : i32
    %c0_i32_594 = arith.constant 0 : i32
    %981 = arith.cmpi eq, %c8_i32_593, %c0_i32_594 : i32
    %c1_i32_595 = arith.constant 1 : i32
    %982 = arith.select %981, %c1_i32_595, %c8_i32_593 : i32
    %983 = arith.remsi %980, %982 : i32
    %c0_i32_596 = arith.constant 0 : i32
    %984 = arith.cmpi ne, %983, %c0_i32_596 : i32
    %c0_i32_597 = arith.constant 0 : i32
    %985 = arith.cmpi slt, %983, %c0_i32_597 : i32
    %c0_i32_598 = arith.constant 0 : i32
    %986 = arith.cmpi slt, %982, %c0_i32_598 : i32
    %987 = arith.xori %985, %986 : i1
    %988 = arith.andi %987, %984 : i1
    %989 = arith.addi %983, %982 : i32
    %990 = arith.select %988, %989, %983 : i32
    %c0_599 = arith.constant 0 : index
    %991 = arith.index_cast %990 : i32 to index
    %c0_600 = arith.constant 0 : index
    %c0_601 = arith.constant 0 : index
    %992 = vector.load %arg3[%c0_599, %991, %c0_600, %c0_601] : memref<2x8x9x128xf32, #tpu.memory_space<vmem>>, vector<2x1x9x128xf32>
    %993 = vector.shape_cast %992 : vector<2x1x9x128xf32> to vector<2x9x128xf32>
    %994 = vector.shape_cast %13 : vector<9x128xi1> to vector<1x9x128xi1>
    %995 = vector.broadcast %994 : vector<1x9x128xi1> to vector<2x9x128xi1>
    %996 = arith.select %995, %993, %979 : vector<2x9x128xi1>, vector<2x9x128xf32>
    %c6_i32_602 = arith.constant 6 : i32
    %997 = arith.addi %908, %c6_i32_602 : i32
    %c8_i32_603 = arith.constant 8 : i32
    %c0_i32_604 = arith.constant 0 : i32
    %998 = arith.cmpi eq, %c8_i32_603, %c0_i32_604 : i32
    %c1_i32_605 = arith.constant 1 : i32
    %999 = arith.select %998, %c1_i32_605, %c8_i32_603 : i32
    %1000 = arith.remsi %997, %999 : i32
    %c0_i32_606 = arith.constant 0 : i32
    %1001 = arith.cmpi ne, %1000, %c0_i32_606 : i32
    %c0_i32_607 = arith.constant 0 : i32
    %1002 = arith.cmpi slt, %1000, %c0_i32_607 : i32
    %c0_i32_608 = arith.constant 0 : i32
    %1003 = arith.cmpi slt, %999, %c0_i32_608 : i32
    %1004 = arith.xori %1002, %1003 : i1
    %1005 = arith.andi %1004, %1001 : i1
    %1006 = arith.addi %1000, %999 : i32
    %1007 = arith.select %1005, %1006, %1000 : i32
    %c0_609 = arith.constant 0 : index
    %1008 = arith.index_cast %1007 : i32 to index
    %c0_610 = arith.constant 0 : index
    %c0_611 = arith.constant 0 : index
    %1009 = vector.load %arg3[%c0_609, %1008, %c0_610, %c0_611] : memref<2x8x9x128xf32, #tpu.memory_space<vmem>>, vector<2x1x9x128xf32>
    %1010 = vector.shape_cast %1009 : vector<2x1x9x128xf32> to vector<2x9x128xf32>
    %1011 = vector.shape_cast %15 : vector<9x128xi1> to vector<1x9x128xi1>
    %1012 = vector.broadcast %1011 : vector<1x9x128xi1> to vector<2x9x128xi1>
    %1013 = arith.select %1012, %1010, %996 : vector<2x9x128xi1>, vector<2x9x128xf32>
    %c7_i32_612 = arith.constant 7 : i32
    %1014 = arith.addi %908, %c7_i32_612 : i32
    %c8_i32_613 = arith.constant 8 : i32
    %c0_i32_614 = arith.constant 0 : i32
    %1015 = arith.cmpi eq, %c8_i32_613, %c0_i32_614 : i32
    %c1_i32_615 = arith.constant 1 : i32
    %1016 = arith.select %1015, %c1_i32_615, %c8_i32_613 : i32
    %1017 = arith.remsi %1014, %1016 : i32
    %c0_i32_616 = arith.constant 0 : i32
    %1018 = arith.cmpi ne, %1017, %c0_i32_616 : i32
    %c0_i32_617 = arith.constant 0 : i32
    %1019 = arith.cmpi slt, %1017, %c0_i32_617 : i32
    %c0_i32_618 = arith.constant 0 : i32
    %1020 = arith.cmpi slt, %1016, %c0_i32_618 : i32
    %1021 = arith.xori %1019, %1020 : i1
    %1022 = arith.andi %1021, %1018 : i1
    %1023 = arith.addi %1017, %1016 : i32
    %1024 = arith.select %1022, %1023, %1017 : i32
    %c0_619 = arith.constant 0 : index
    %1025 = arith.index_cast %1024 : i32 to index
    %c0_620 = arith.constant 0 : index
    %c0_621 = arith.constant 0 : index
    %1026 = vector.load %arg3[%c0_619, %1025, %c0_620, %c0_621] : memref<2x8x9x128xf32, #tpu.memory_space<vmem>>, vector<2x1x9x128xf32>
    %1027 = vector.shape_cast %1026 : vector<2x1x9x128xf32> to vector<2x9x128xf32>
    %1028 = vector.shape_cast %17 : vector<9x128xi1> to vector<1x9x128xi1>
    %1029 = vector.broadcast %1028 : vector<1x9x128xi1> to vector<2x9x128xi1>
    %1030 = arith.select %1029, %1027, %1013 : vector<2x9x128xi1>, vector<2x9x128xf32>
    %c0_622 = arith.constant 0 : index
    %c7 = arith.constant 7 : index
    %c0_623 = arith.constant 0 : index
    %c0_624 = arith.constant 0 : index
    %1031 = vector.load %arg4[%c0_622, %c7, %c0_623, %c0_624] : memref<2x8x9x128xf32, #tpu.memory_space<vmem>>, vector<2x1x9x128xf32>
    %1032 = vector.shape_cast %1031 : vector<2x1x9x128xf32> to vector<2x9x128xf32>
    %1033 = vector.shape_cast %1030 : vector<2x9x128xf32> to vector<2x1x9x128xf32>
    tpu.vector_store %arg4[%c0_622, %c7, %c0_623, %c0_624], %1033 {strides = array<i32>} : memref<2x8x9x128xf32, #tpu.memory_space<vmem>>, vector<2x1x9x128xf32>,
    return
  }
  func.func @transform_0(%arg0: i32, %arg1: i32) -> (i32, i32) {
    %c0_i32 = arith.constant 0 : i32
    %c0_i32_0 = arith.constant 0 : i32
    return %arg0, %c0_i32 : i32, i32
  }
  func.func @transform_1(%arg0: i32, %arg1: i32) -> (i32, i32, i32, i32) {
    %c0_i32 = arith.constant 0 : i32
    %c0_i32_0 = arith.constant 0 : i32
    %c0_i32_1 = arith.constant 0 : i32
    %c0_i32_2 = arith.constant 0 : i32
    return %c0_i32, %c0_i32_0, %arg0, %c0_i32_1 : i32, i32, i32, i32
  }
  func.func @transform_2(%arg0: i32, %arg1: i32) -> (i32, i32, i32, i32) {
    %c0_i32 = arith.constant 0 : i32
    %c0_i32_0 = arith.constant 0 : i32
    %c0_i32_1 = arith.constant 0 : i32
    return %c0_i32, %arg1, %arg0, %c0_i32_0 : i32, i32, i32, i32
  }
}

</mosaic_0001>

<bundles_post_ra>
// kernel: tpu_custom_call.1
= control target key start
LH: loop header
LB: loop body
LE: loop exit
PB: predicated region body
PF: predicated region fallthrough
CT: control target
= control target key end

     0   :  { %s2287_s0 = inlined_call_operand.vmem [shape: s32[9,128], index: 0, kind: input, shape index: {}]   ;;  %s2288_s1 = inlined_call_operand.vmem [shape: f32[2,8,9,128], index: 1, kind: input, shape index: {}]   ;;  %s2289_s2 = inlined_call_operand.vmem [shape: f32[2,8,9,128], index: 2, kind: output, shape index: {}]  }
   0x1   :  { %v1114_v0 = vld [vmem:[%s2287_s0] sm:$0xff]  ;;  %v1124_v2 = vld [vmem:[%s2288_s1 + $0x10] sm:$0xff]  ;;  %v1180_v13 = vld [vmem:[%s2287_s0 + $0x8] sm:$0x1] }
   0x2   :  { %v1119_v1 = vld [vmem:[%s2288_s1] sm:$0xff]  ;;  %vm13_vm0 = vcmp.eq.s32.totalorder %v1114_v0, 3  ;;  %vm15_vm1 = vcmp.eq.s32.totalorder %v1114_v0, 6  ;;  %vm17_vm2 = vcmp.eq.s32.totalorder %v1114_v0, 7  ;;  %vm19_vm3 = vcmp.eq.s32.totalorder %v1114_v0, 0  ;;  %v1138_v4 = vld [vmem:[%s2288_s1 + $0x30] sm:$0xff] }
   0x3   :  { %v1133_v3 = vld [vmem:[%s2288_s1 + $0x20] sm:$0xff]  ;;  %vm21_vm4 = vcmp.eq.s32.totalorder %v1114_v0, 8  ;;  %vm25_vm5 = vcmp.eq.s32.totalorder %v1114_v0, 5  ;;  %vm27_vm6 = vcmp.eq.s32.totalorder %v1114_v0, 2  ;;  %vm29_vm7 = vcmp.eq.s32.totalorder %v1114_v0, 1  ;;  %v1152_v6 = vld [vmem:[%s2288_s1 + $0x50] sm:$0xff] }
   0x4   :  { %v1147_v5 = vld [vmem:[%s2288_s1 + $0x40] sm:$0xff]  ;;  %vm1154_vm8 = vmor %vm19_vm3, %vm21_vm4  ;;  %v61_v8 = vsel %vm13_vm0, %v1124_v2, %v1119_v1  ;;  %v241_v9 = vsel %vm13_vm0, %v1133_v3, %v1124_v2  ;;  %v323_v10 = vsel %vm13_vm0, %v1138_v4, %v1133_v3  ;;  %v35_v14 = vld [vmem:[%s2288_s1 + $0x8] sm:$0x1]  ;;  %vm14_vm9 = vcmp.eq.s32.totalorder %v1180_v13, 3 }
   0x5   :  { %v405_v11 = vsel %vm13_vm0, %v1147_v5, %v1138_v4  ;;  %v88_v12 = vsel %vm15_vm1, %v1133_v3, %v61_v8  ;;  %v845_v15 = vld [vmem:[%s2288_s1 + $0x18] sm:$0x1]  ;;  %v249_v16 = vsel %vm15_vm1, %v1138_v4, %v241_v9  ;;  %v1194_v17 = vsel %vm15_vm1, %v1147_v5, %v323_v10  ;;  %v1207_v20 = vld [vmem:[%s2288_s1 + $0x60] sm:$0xff]  ;;  %v849_v21 = vld [vmem:[%s2288_s1 + $0x28] sm:$0x1] }
   0x6   :  { %v1199_v18 = vsel %vm15_vm1, %v1152_v6, %v405_v11  ;;  %v115_v19 = vsel %vm17_vm2, %v1138_v4, %v88_v12  ;;  %vm16_vm10 = vcmp.eq.s32.totalorder %v1180_v13, 6  ;;  %vm18_vm11 = vcmp.eq.s32.totalorder %v1180_v13, 7  ;;  %v1218_v22 = vld [vmem:[%s2288_s1 + $0x80] sm:$0xff]  ;;  %v853_v24 = vld [vmem:[%s2288_s1 + $0x38] sm:$0x1]  ;;  %v1232_v25 = vld [vmem:[%s2288_s1 + $0x90] sm:$0xff] }
   0x7   :  { %v142_v23 = vsel %vm1154_vm8, %v1147_v5, %v115_v19  ;;  %vm20_vm12 = vcmp.eq.s32.totalorder %v1180_v13, 0  ;;  %vm22_vm13 = vcmp.eq.s32.totalorder %v1180_v13, 8  ;;  %vm26_vm14 = vcmp.eq.s32.totalorder %v1180_v13, 5  ;;  %v1240_v27 = vld [vmem:[%s2288_s1 + $0x70] sm:$0xff]  ;;  %v857_v30 = vld [vmem:[%s2288_s1 + $0x48] sm:$0x1] }
   0x8   :  { %v169_v26 = vsel %vm25_vm5, %v1152_v6, %v142_v23  ;;  %vm1242_vm15 = vmor %vm20_vm12, %vm22_vm13  ;;  %vm28_vm3 = vcmp.eq.s32.totalorder %v1180_v13, 2  ;;  %vm30_vm4 = vcmp.eq.s32.totalorder %v1180_v13, 1  ;;  %v62_v29 = vsel %vm14_vm9, %v845_v15, %v35_v14  ;;  %v861_v33 = vld [vmem:[%s2288_s1 + $0x58] sm:$0x1]  ;;  %v865_v34 = vld [vmem:[%s2288_s1 + $0x68] sm:$0x1] }
   0x9   :  { %v196_v31 = vsel %vm27_vm6, %v1207_v20, %v169_v26  ;;  %v89_v32 = vsel %vm16_vm10, %v849_v21, %v62_v29  ;;  %v63_v35 = vsel %vm13_vm0, %v1232_v25, %v1218_v22  ;;  %v1271_v36 = vld [vmem:[%s2288_s1 + $0xa0] sm:$0xff]  ;;  %v257_v37 = vsel %vm17_vm2, %v1147_v5, %v249_v16  ;;  %v869_v40 = vld [vmem:[%s2288_s1 + $0x78] sm:$0x1]  ;;  %v1290_v42 = vld [vmem:[%s2288_s1 + $0xb0] sm:$0xff] }
   0xa   :  { %v223_v38 = vsel %vm29_vm7, %v1240_v27, %v196_v31  ;;  %v116_v39 = vsel %vm18_vm11, %v853_v24, %v89_v32  ;;  %v90_v41 = vsel %vm15_vm1, %v1271_v36, %v63_v35  ;;  %v1295_v43 = vld [vmem:[%s2288_s1 + $0xc0] sm:$0xff]  ;;  %v265_v44 = vsel %vm1154_vm8, %v1152_v6, %v257_v37  ;;  %v1311_v47 = vld [vmem:[%s2288_s1 + $0xd0] sm:$0xff]  ;;  %v37_v49 = vld [vmem:[%s2288_s1 + $0x88] sm:$0x1] }
   0xb   :  { %227 = vst [vmem:[%s2289_s2] sm:$0xff] %v223_v38  ;;  %v143_v45 = vsel %vm1242_vm15, %v857_v30, %v116_v39  ;;  %v117_v46 = vsel %vm17_vm2, %v1290_v42, %v90_v41  ;;  %v1316_v48 = vld [vmem:[%s2288_s1 + $0xe0] sm:$0xff]  ;;  %v273_v50 = vsel %vm25_vm5, %v1207_v20, %v265_v44  ;;  %v243_v51 = vsel %vm13_vm0, %v1271_v36, %v1232_v25  ;;  %v847_v54 = vld [vmem:[%s2288_s1 + $0x98] sm:$0x1]  ;;  %v851_v55 = vld [vmem:[%s2288_s1 + $0xa8] sm:$0x1] }
   0xc   :  { %v170_v52 = vsel %vm26_vm14, %v861_v33, %v143_v45  ;;  %v144_v53 = vsel %vm1154_vm8, %v1295_v43, %v117_v46  ;;  %v855_v56 = vld [vmem:[%s2288_s1 + $0xb8] sm:$0x1]  ;;  %v281_v57 = vsel %vm27_vm6, %v1240_v27, %v273_v50  ;;  %v251_v58 = vsel %vm15_vm1, %v1290_v42, %v243_v51  ;;  %v859_v62 = vld [vmem:[%s2288_s1 + $0xc8] sm:$0x1]  ;;  %v1375_v12 = vld [vmem:[%s2288_s1 + $0xf0] sm:$0xff] }
   0xd   :  { %v197_v59 = vsel %vm28_vm3, %v865_v34, %v170_v52  ;;  %v171_v60 = vsel %vm25_vm5, %v1311_v47, %v144_v53  ;;  %v64_v61 = vsel %vm14_vm9, %v847_v54, %v37_v49  ;;  %v863_v63 = vld [vmem:[%s2288_s1 + $0xd8] sm:$0x1]  ;;  %v867_v8 = vld [vmem:[%s2288_s1 + $0xe8] sm:$0x1]  ;;  %v304_v9 = vsel %vm29_vm7, %v1119_v1, %v281_v57 }
   0xe   :  { %v224_v10 = vsel %vm30_vm4, %v869_v40, %v197_v59  ;;  %v198_v11 = vsel %vm27_vm6, %v1316_v48, %v171_v60  ;;  %v91_v14 = vsel %vm16_vm10, %v851_v55, %v64_v61  ;;  %v871_v15 = vld [vmem:[%s2288_s1 + $0xf8] sm:$0x1]  ;;  %900 = vst [vmem:[%s2289_s2 + $0x10] sm:$0xff] %v304_v9  ;;  %v259_v19 = vsel %vm17_vm2, %v1295_v43, %v251_v58  ;;  %v877_v24 = vld [vmem:[%s2288_s1 + $0x28] sm:$0x1] }
   0xf   :  { %v873_v16 = vld [vmem:[%s2288_s1 + $0x18] sm:$0x1]  ;;  %228 = vst [vmem:[%s2289_s2 + $0x8] sm:$0x1] %v224_v10  ;;  %v225_v21 = vsel %vm29_vm7, %v1375_v12, %v198_v11  ;;  %v118_v23 = vsel %vm18_vm11, %v855_v56, %v91_v14  ;;  %v267_v29 = vsel %vm1154_vm8, %v1311_v47, %v259_v19  ;;  %v339_v30 = vsel %vm17_vm2, %v1152_v6, %v1194_v17  ;;  %v885_v33 = vld [vmem:[%s2288_s1 + $0x48] sm:$0x1] }
  0x10   :  { %v881_v26 = vld [vmem:[%s2288_s1 + $0x38] sm:$0x1]  ;;  %229 = vst [vmem:[%s2289_s2 + $0x80] sm:$0xff] %v225_v21  ;;  %v145_v31 = vsel %vm1242_vm15, %v859_v62, %v118_v23  ;;  %v242_v32 = vsel %vm14_vm9, %v877_v24, %v873_v16  ;;  %v275_v17 = vsel %vm25_vm5, %v1316_v48, %v267_v29  ;;  %v347_v35 = vsel %vm1154_vm8, %v1207_v20, %v339_v30  ;;  %v893_v39 = vld [vmem:[%s2288_s1 + $0x68] sm:$0x1] }
  0x11   :  { %v889_v34 = vld [vmem:[%s2288_s1 + $0x58] sm:$0x1]  ;;  %v172_v37 = vsel %vm26_vm14, %v863_v63, %v145_v31  ;;  %v250_v38 = vsel %vm16_vm10, %v881_v26, %v242_v32  ;;  %v301_v41 = vld [vmem:[%s2288_s1 + $0x8] sm:$0x1]  ;;  %v283_v44 = vsel %vm27_vm6, %v1375_v12, %v275_v17  ;;  %v355_v45 = vsel %vm25_vm5, %v1240_v27, %v347_v35 }
  0x12   :  { %v897_v40 = vld [vmem:[%s2288_s1 + $0x78] sm:$0x1]  ;;  %v199_v46 = vsel %vm28_vm3, %v867_v8, %v172_v37  ;;  %v258_v49 = vsel %vm18_vm11, %v885_v33, %v250_v38  ;;  %v306_v50 = vsel %vm29_vm7, %v1218_v22, %v283_v44  ;;  %v879_v52 = vld [vmem:[%s2288_s1 + $0xa8] sm:$0x1]  ;;  %v363_v54 = vsel %vm27_vm6, %v1119_v1, %v355_v45 }
  0x13   :  { %v875_v51 = vld [vmem:[%s2288_s1 + $0x98] sm:$0x1]  ;;  %v226_v55 = vsel %vm30_vm4, %v871_v15, %v199_v46  ;;  %v266_v56 = vsel %vm1242_vm15, %v889_v34, %v258_v49  ;;  %902 = vst [vmem:[%s2289_s2 + $0x90] sm:$0xff] %v306_v50  ;;  %v887_v58 = vld [vmem:[%s2288_s1 + $0xc8] sm:$0x1]  ;;  %v386_v60 = vsel %vm29_vm7, %v1124_v2, %v363_v54  ;;  %v325_v9 = vsel %vm13_vm0, %v1290_v42, %v1271_v36 }
  0x14   :  { %v883_v53 = vld [vmem:[%s2288_s1 + $0xb8] sm:$0x1]  ;;  %v244_v57 = vsel %vm14_vm9, %v879_v52, %v875_v51  ;;  %230 = vst [vmem:[%s2289_s2 + $0x88] sm:$0x1] %v226_v55  ;;  %v274_v61 = vsel %vm26_vm14, %v893_v39, %v266_v56  ;;  %v895_v63 = vld [vmem:[%s2288_s1 + $0xe8] sm:$0x1]  ;;  %v421_v10 = vsel %vm17_vm2, %v1207_v20, %v1199_v18  ;;  %v333_v18 = vsel %vm15_vm1, %v1295_v43, %v325_v9 }
  0x15   :  { %v891_v59 = vld [vmem:[%s2288_s1 + $0xd8] sm:$0x1]  ;;  %v252_v62 = vsel %vm16_vm10, %v883_v53, %v244_v57  ;;  %v282_v11 = vsel %vm28_vm3, %v897_v40, %v274_v61  ;;  %v303_v15 = vld [vmem:[%s2288_s1 + $0x88] sm:$0x1]  ;;  %932 = vst [vmem:[%s2289_s2 + $0x20] sm:$0xff] %v386_v60  ;;  %v429_v19 = vsel %vm1154_vm8, %v1240_v27, %v421_v10  ;;  %v341_v30 = vsel %vm17_vm2, %v1311_v47, %v333_v18 }
  0x16   :  { %v899_v8 = vld [vmem:[%s2288_s1 + $0xf8] sm:$0x1]  ;;  %v260_v14 = vsel %vm18_vm11, %v887_v58, %v252_v62  ;;  %v905_v16 = vld [vmem:[%s2288_s1 + $0x28] sm:$0x1]  ;;  %v305_v21 = vsel %vm30_vm4, %v301_v41, %v282_v11  ;;  %v437_v31 = vsel %vm25_vm5, %v1119_v1, %v429_v19  ;;  %v349_v35 = vsel %vm1154_vm8, %v1316_v48, %v341_v30 }
  0x17   :  { %v268_v23 = vsel %vm1242_vm15, %v891_v59, %v260_v14  ;;  %v909_v24 = vld [vmem:[%s2288_s1 + $0x38] sm:$0x1]  ;;  %v913_v26 = vld [vmem:[%s2288_s1 + $0x48] sm:$0x1]  ;;  %901 = vst [vmem:[%s2289_s2 + $0x18] sm:$0x1] %v305_v21  ;;  %v445_v37 = vsel %vm27_vm6, %v1124_v2, %v437_v31  ;;  %v357_v44 = vsel %vm25_vm5, %v1375_v12, %v349_v35  ;;  %v407_v55 = vsel %vm13_vm0, %v1295_v43, %v1290_v42 }
  0x18   :  { %v917_v29 = vld [vmem:[%s2288_s1 + $0x58] sm:$0x1]  ;;  %v276_v32 = vsel %vm26_vm14, %v895_v63, %v268_v23  ;;  %v324_v33 = vsel %vm14_vm9, %v909_v24, %v905_v16  ;;  %v921_v34 = vld [vmem:[%s2288_s1 + $0x68] sm:$0x1]  ;;  %v468_v46 = vsel %vm29_vm7, %v1133_v3, %v445_v37  ;;  %v365_v51 = vsel %vm27_vm6, %v1218_v22, %v357_v44 }
  0x19   :  { %v925_v17 = vld [vmem:[%s2288_s1 + $0x78] sm:$0x1]  ;;  %v284_v38 = vsel %vm28_vm3, %v899_v8, %v276_v32  ;;  %v332_v39 = vsel %vm16_vm10, %v913_v26, %v324_v33  ;;  %v360_v40 = vld [vmem:[%s2288_s1 + $0x8] sm:$0x1]  ;;  %v388_v57 = vsel %vm29_vm7, %v1232_v25, %v365_v51  ;;  %v415_v61 = vsel %vm15_vm1, %v1311_v47, %v407_v55  ;;  %964 = vst [vmem:[%s2289_s2 + $0x30] sm:$0xff] %v468_v46 }
  0x1a   :  { %v929_v41 = vld [vmem:[%s2288_s1 + $0x18] sm:$0x1]  ;;  %v907_v45 = vld [vmem:[%s2288_s1 + $0xa8] sm:$0x1]  ;;  %v307_v49 = vsel %vm30_vm4, %v303_v15, %v284_v38  ;;  %v340_v50 = vsel %vm18_vm11, %v917_v29, %v332_v39  ;;  %934 = vst [vmem:[%s2289_s2 + $0xa0] sm:$0xff] %v388_v57  ;;  %v423_v10 = vsel %vm17_vm2, %v1316_v48, %v415_v61  ;;  %v487_v11 = vsel %vm13_vm0, %v1152_v6, %v1147_v5 }
  0x1b   :  { %v911_v52 = vld [vmem:[%s2288_s1 + $0xb8] sm:$0x1]  ;;  %v915_v53 = vld [vmem:[%s2288_s1 + $0xc8] sm:$0x1]  ;;  %903 = vst [vmem:[%s2289_s2 + $0x98] sm:$0x1] %v307_v49  ;;  %v348_v56 = vsel %vm1242_vm15, %v921_v34, %v340_v50  ;;  %v431_v19 = vsel %vm1154_vm8, %v1375_v12, %v423_v10  ;;  %v495_v21 = vsel %vm15_vm1, %v1207_v20, %v487_v11  ;;  %v489_v61 = vsel %vm13_vm0, %v1311_v47, %v1295_v43 }
  0x1c   :  { %v919_v54 = vld [vmem:[%s2288_s1 + $0xd8] sm:$0x1]  ;;  %v326_v58 = vsel %vm14_vm9, %v911_v52, %v907_v45  ;;  %v923_v59 = vld [vmem:[%s2288_s1 + $0xe8] sm:$0x1]  ;;  %v356_v62 = vsel %vm26_vm14, %v925_v17, %v348_v56  ;;  %v439_v32 = vsel %vm25_vm5, %v1218_v22, %v431_v19  ;;  %v503_v38 = vsel %vm17_vm2, %v1240_v27, %v495_v21 }
  0x1d   :  { %v927_v60 = vld [vmem:[%s2288_s1 + $0xf8] sm:$0x1]  ;;  %v334_v63 = vsel %vm16_vm10, %v915_v53, %v326_v58  ;;  %v362_v8 = vld [vmem:[%s2288_s1 + $0x88] sm:$0x1]  ;;  %v364_v14 = vsel %vm28_vm3, %v360_v40, %v356_v62  ;;  %v447_v37 = vsel %vm27_vm6, %v1232_v25, %v439_v32  ;;  %v511_v49 = vsel %vm1154_vm8, %v1119_v1, %v503_v38 }
  0x1e   :  { %v931_v9 = vld [vmem:[%s2288_s1 + $0x98] sm:$0x1]  ;;  %v342_v15 = vsel %vm18_vm11, %v919_v54, %v334_v63  ;;  %v941_v18 = vld [vmem:[%s2288_s1 + $0x48] sm:$0x1]  ;;  %v387_v23 = vsel %vm30_vm4, %v929_v41, %v364_v14  ;;  %v470_v44 = vsel %vm29_vm7, %v1271_v36, %v447_v37  ;;  %v519_v55 = vsel %vm25_vm5, %v1124_v2, %v511_v49 }
  0x1f   :  { %v937_v16 = vld [vmem:[%s2288_s1 + $0x38] sm:$0x1]  ;;  %v350_v24 = vsel %vm1242_vm15, %v923_v59, %v342_v15  ;;  %v949_v30 = vld [vmem:[%s2288_s1 + $0x68] sm:$0x1]  ;;  %933 = vst [vmem:[%s2289_s2 + $0x28] sm:$0x1] %v387_v23  ;;  %v497_v14 = vsel %vm15_vm1, %v1316_v48, %v489_v61  ;;  %v569_v23 = vsel %vm13_vm0, %v1207_v20, %v1152_v6 }
  0x20   :  { %v406_v26 = vsel %vm14_vm9, %v941_v18, %v937_v16  ;;  %v945_v29 = vld [vmem:[%s2288_s1 + $0x58] sm:$0x1]  ;;  %v358_v33 = vsel %vm26_vm14, %v927_v60, %v350_v24  ;;  %v434_v17 = vld [vmem:[%s2288_s1 + $0x8] sm:$0x1]  ;;  %966 = vst [vmem:[%s2289_s2 + $0xb0] sm:$0xff] %v470_v44  ;;  %v527_v60 = vsel %vm27_vm6, %v1133_v3, %v519_v55  ;;  %v505_v21 = vsel %vm17_vm2, %v1375_v12, %v497_v14 }
  0x21   :  { %v953_v31 = vld [vmem:[%s2288_s1 + $0x78] sm:$0x1]  ;;  %v414_v34 = vsel %vm16_vm10, %v945_v29, %v406_v26  ;;  %v366_v39 = vsel %vm28_vm3, %v362_v8, %v358_v33  ;;  %v961_v41 = vld [vmem:[%s2288_s1 + $0x28] sm:$0x1]  ;;  %v550_v10 = vsel %vm29_vm7, %v1138_v4, %v527_v60  ;;  %v577_v32 = vsel %vm15_vm1, %v1240_v27, %v569_v23 }
  0x22   :  { %v957_v35 = vld [vmem:[%s2288_s1 + $0x18] sm:$0x1]  ;;  %v422_v40 = vsel %vm18_vm11, %v949_v30, %v414_v34  ;;  %v943_v46 = vld [vmem:[%s2288_s1 + $0xc8] sm:$0x1]  ;;  %v389_v50 = vsel %vm30_vm4, %v931_v9, %v366_v39  ;;  %996 = vst [vmem:[%s2289_s2 + $0x40] sm:$0xff] %v550_v10  ;;  %v585_v39 = vsel %vm17_vm2, %v1119_v1, %v577_v32 }
  0x23   :  { %v939_v45 = vld [vmem:[%s2288_s1 + $0xb8] sm:$0x1]  ;;  %v430_v51 = vsel %vm1242_vm15, %v953_v31, %v422_v40  ;;  %v951_v54 = vld [vmem:[%s2288_s1 + $0xe8] sm:$0x1]  ;;  %935 = vst [vmem:[%s2289_s2 + $0xa8] sm:$0x1] %v389_v50  ;;  %v513_v31 = vsel %vm1154_vm8, %v1218_v22, %v505_v21  ;;  %v593_v50 = vsel %vm1154_vm8, %v1124_v2, %v585_v39 }
  0x24   :  { %v408_v52 = vsel %vm14_vm9, %v943_v46, %v939_v45  ;;  %v947_v53 = vld [vmem:[%s2288_s1 + $0xd8] sm:$0x1]  ;;  %v438_v56 = vsel %vm26_vm14, %v434_v17, %v430_v51  ;;  %v436_v59 = vld [vmem:[%s2288_s1 + $0x88] sm:$0x1]  ;;  %v521_v38 = vsel %vm25_vm5, %v1232_v25, %v513_v31 }
  0x25   :  { %v416_v57 = vsel %vm16_vm10, %v947_v53, %v408_v52  ;;  %v955_v58 = vld [vmem:[%s2288_s1 + $0xf8] sm:$0x1]  ;;  %v446_v62 = vsel %vm28_vm3, %v957_v35, %v438_v56  ;;  %v963_v9 = vld [vmem:[%s2288_s1 + $0xa8] sm:$0x1]  ;;  %v529_v44 = vsel %vm27_vm6, %v1271_v36, %v521_v38  ;;  %v601_v56 = vsel %vm25_vm5, %v1133_v3, %v593_v50 }
  0x26   :  { %v424_v63 = vsel %vm18_vm11, %v951_v54, %v416_v57  ;;  %v959_v8 = vld [vmem:[%s2288_s1 + $0x98] sm:$0x1]  ;;  %v969_v11 = vld [vmem:[%s2288_s1 + $0x48] sm:$0x1]  ;;  %v469_v15 = vsel %vm30_vm4, %v961_v41, %v446_v62  ;;  %v552_v52 = vsel %vm29_vm7, %v1290_v42, %v529_v44  ;;  %v609_v61 = vsel %vm27_vm6, %v1138_v4, %v601_v56 }
  0x27   :  { %v432_v16 = vsel %vm1242_vm15, %v955_v58, %v424_v63  ;;  %v973_v18 = vld [vmem:[%s2288_s1 + $0x58] sm:$0x1]  ;;  %v977_v19 = vld [vmem:[%s2288_s1 + $0x68] sm:$0x1]  ;;  %965 = vst [vmem:[%s2289_s2 + $0x38] sm:$0x1] %v469_v15  ;;  %v571_v62 = vsel %vm13_vm0, %v1316_v48, %v1311_v47  ;;  %v632_v10 = vsel %vm29_vm7, %v1147_v5, %v609_v61 }
  0x28   :  { %v440_v24 = vsel %vm26_vm14, %v436_v59, %v432_v16  ;;  %v488_v26 = vsel %vm14_vm9, %v973_v18, %v969_v11  ;;  %v981_v29 = vld [vmem:[%s2288_s1 + $0x78] sm:$0x1]  ;;  %v508_v30 = vld [vmem:[%s2288_s1 + $0x8] sm:$0x1]  ;;  %998 = vst [vmem:[%s2289_s2 + $0xc0] sm:$0xff] %v552_v52  ;;  %v579_v15 = vsel %vm15_vm1, %v1375_v12, %v571_v62 }
  0x29   :  { %v448_v33 = vsel %vm28_vm3, %v959_v8, %v440_v24  ;;  %v496_v34 = vsel %vm16_vm10, %v977_v19, %v488_v26  ;;  %v985_v17 = vld [vmem:[%s2288_s1 + $0x18] sm:$0x1]  ;;  %v989_v35 = vld [vmem:[%s2288_s1 + $0x28] sm:$0x1]  ;;  %1028 = vst [vmem:[%s2289_s2 + $0x50] sm:$0xff] %v632_v10  ;;  %v587_v24 = vsel %vm17_vm2, %v1218_v22, %v579_v15 }
  0x2a   :  { %v993_v37 = vld [vmem:[%s2288_s1 + $0x38] sm:$0x1]  ;;  %v471_v40 = vsel %vm30_vm4, %v963_v9, %v448_v33  ;;  %v504_v41 = vsel %vm18_vm11, %v981_v29, %v496_v34  ;;  %v971_v45 = vld [vmem:[%s2288_s1 + $0xc8] sm:$0x1]  ;;  %v595_v32 = vsel %vm1154_vm8, %v1232_v25, %v587_v24  ;;  %v651_v33 = vsel %vm13_vm0, %v1240_v27, %v1207_v20 }
  0x2b   :  { %v975_v46 = vld [vmem:[%s2288_s1 + $0xd8] sm:$0x1]  ;;  %v979_v49 = vld [vmem:[%s2288_s1 + $0xe8] sm:$0x1]  ;;  %967 = vst [vmem:[%s2289_s2 + $0xb8] sm:$0x1] %v471_v40  ;;  %v512_v51 = vsel %vm1242_vm15, %v508_v30, %v504_v41  ;;  %v603_v38 = vsel %vm25_vm5, %v1271_v36, %v595_v32  ;;  %v659_v40 = vsel %vm15_vm1, %v1119_v1, %v651_v33 }
  0x2c   :  { %v490_v53 = vsel %vm14_vm9, %v975_v46, %v971_v45  ;;  %v983_v54 = vld [vmem:[%s2288_s1 + $0xf8] sm:$0x1]  ;;  %v510_v55 = vld [vmem:[%s2288_s1 + $0x88] sm:$0x1]  ;;  %v520_v57 = vsel %vm26_vm14, %v985_v17, %v512_v51  ;;  %v611_v45 = vsel %vm27_vm6, %v1290_v42, %v603_v38  ;;  %v667_v51 = vsel %vm17_vm2, %v1124_v2, %v659_v40 }
  0x2d   :  { %v498_v58 = vsel %vm16_vm10, %v979_v49, %v490_v53  ;;  %v987_v59 = vld [vmem:[%s2288_s1 + $0x98] sm:$0x1]  ;;  %v991_v60 = vld [vmem:[%s2288_s1 + $0xa8] sm:$0x1]  ;;  %v528_v63 = vsel %vm28_vm3, %v989_v35, %v520_v57  ;;  %v634_v53 = vsel %vm29_vm7, %v1295_v43, %v611_v45  ;;  %v675_v57 = vsel %vm1154_vm8, %v1133_v3, %v667_v51 }
  0x2e   :  { %v506_v8 = vsel %vm18_vm11, %v983_v54, %v498_v58  ;;  %v995_v9 = vld [vmem:[%s2288_s1 + $0xb8] sm:$0x1]  ;;  %v1005_v14 = vld [vmem:[%s2288_s1 + $0x68] sm:$0x1]  ;;  %v551_v16 = vsel %vm30_vm4, %v993_v37, %v528_v63  ;;  %1030 = vst [vmem:[%s2289_s2 + $0xd0] sm:$0xff] %v634_v53  ;;  %v683_v62 = vsel %vm25_vm5, %v1138_v4, %v675_v57  ;;  %v653_v63 = vsel %vm13_vm0, %v1375_v12, %v1316_v48 }
  0x2f   :  { %v1001_v11 = vld [vmem:[%s2288_s1 + $0x58] sm:$0x1]  ;;  %v514_v18 = vsel %vm1242_vm15, %v510_v55, %v506_v8  ;;  %v582_v23 = vld [vmem:[%s2288_s1 + $0x8] sm:$0x1]  ;;  %997 = vst [vmem:[%s2289_s2 + $0x48] sm:$0x1] %v551_v16  ;;  %v691_v10 = vsel %vm27_vm6, %v1147_v5, %v683_v62  ;;  %v661_v16 = vsel %vm15_vm1, %v1218_v22, %v653_v63 }
  0x30   :  { %v570_v19 = vsel %vm14_vm9, %v1005_v14, %v1001_v11  ;;  %v1009_v21 = vld [vmem:[%s2288_s1 + $0x78] sm:$0x1]  ;;  %v522_v26 = vsel %vm26_vm14, %v987_v59, %v514_v18  ;;  %v1017_v31 = vld [vmem:[%s2288_s1 + $0x28] sm:$0x1] }
  0x31   :  { %v578_v29 = vsel %vm16_vm10, %v1009_v21, %v570_v19  ;;  %v1013_v30 = vld [vmem:[%s2288_s1 + $0x18] sm:$0x1]  ;;  %v530_v34 = vsel %vm28_vm3, %v991_v60, %v522_v26  ;;  %v1025_v37 = vld [vmem:[%s2288_s1 + $0x48] sm:$0x1]  ;;  %v714_v19 = vsel %vm29_vm7, %v1152_v6, %v691_v10  ;;  %v669_v26 = vsel %vm17_vm2, %v1232_v25, %v661_v16 }
  0x32   :  { %v586_v17 = vsel %vm18_vm11, %v582_v23, %v578_v29  ;;  %v1021_v35 = vld [vmem:[%s2288_s1 + $0x38] sm:$0x1]  ;;  %v553_v41 = vsel %vm30_vm4, %v995_v9, %v530_v34  ;;  %v1007_v46 = vld [vmem:[%s2288_s1 + $0xe8] sm:$0x1]  ;;  %1060 = vst [vmem:[%s2289_s2 + $0x60] sm:$0xff] %v714_v19  ;;  %v677_v33 = vsel %vm1154_vm8, %v1271_v36, %v669_v26  ;;  %v733_v34 = vsel %vm13_vm0, %v1119_v1, %v1240_v27 }
  0x33   :  { %v1003_v39 = vld [vmem:[%s2288_s1 + $0xd8] sm:$0x1]  ;;  %v594_v44 = vsel %vm1242_vm15, %v1013_v30, %v586_v17  ;;  %v584_v50 = vld [vmem:[%s2288_s1 + $0x88] sm:$0x1]  ;;  %999 = vst [vmem:[%s2289_s2 + $0xc8] sm:$0x1] %v553_v41  ;;  %v685_v38 = vsel %vm25_vm5, %v1290_v42, %v677_v33  ;;  %v741_v27 = vsel %vm15_vm1, %v1124_v2, %v733_v34 }
  0x34   :  { %v1011_v49 = vld [vmem:[%s2288_s1 + $0xf8] sm:$0x1]  ;;  %v602_v52 = vsel %vm26_vm14, %v1017_v31, %v594_v44  ;;  %v572_v54 = vsel %vm14_vm9, %v1007_v46, %v1003_v39  ;;  %v1019_v56 = vld [vmem:[%s2288_s1 + $0xa8] sm:$0x1]  ;;  %v693_v44 = vsel %vm27_vm6, %v1295_v43, %v685_v38 }
  0x35   :  { %v1015_v55 = vld [vmem:[%s2288_s1 + $0x98] sm:$0x1]  ;;  %v610_v58 = vsel %vm28_vm3, %v1021_v35, %v602_v52  ;;  %v580_v59 = vsel %vm16_vm10, %v1011_v49, %v572_v54  ;;  %v1027_v61 = vld [vmem:[%s2288_s1 + $0xc8] sm:$0x1]  ;;  %v716_v51 = vsel %vm29_vm7, %v1311_v47, %v693_v44 }
  0x36   :  { %v1023_v60 = vld [vmem:[%s2288_s1 + $0xb8] sm:$0x1]  ;;  %v633_v8 = vsel %vm30_vm4, %v1025_v37, %v610_v58  ;;  %v588_v9 = vsel %vm18_vm11, %v584_v50, %v580_v59  ;;  %v1033_v11 = vld [vmem:[%s2288_s1 + $0x68] sm:$0x1]  ;;  %1062 = vst [vmem:[%s2289_s2 + $0xe0] sm:$0xff] %v716_v51 }
  0x37   :  { %v1037_v14 = vld [vmem:[%s2288_s1 + $0x78] sm:$0x1]  ;;  %v656_v15 = vld [vmem:[%s2288_s1 + $0x8] sm:$0x1]  ;;  %1029 = vst [vmem:[%s2289_s2 + $0x58] sm:$0x1] %v633_v8  ;;  %v596_v18 = vsel %vm1242_vm15, %v1015_v55, %v588_v9  ;;  %v749_v55 = vsel %vm17_vm2, %v1133_v3, %v741_v27 }
  0x38   :  { %v652_v21 = vsel %vm14_vm9, %v1037_v14, %v1033_v11  ;;  %v1041_v23 = vld [vmem:[%s2288_s1 + $0x18] sm:$0x1]  ;;  %v1045_v24 = vld [vmem:[%s2288_s1 + $0x28] sm:$0x1]  ;;  %v604_v29 = vsel %vm26_vm14, %v1019_v56, %v596_v18  ;;  %v757_v59 = vsel %vm1154_vm8, %v1138_v4, %v749_v55 }
  0x39   :  { %v660_v30 = vsel %vm16_vm10, %v656_v15, %v652_v21  ;;  %v1049_v31 = vld [vmem:[%s2288_s1 + $0x38] sm:$0x1]  ;;  %v1053_v32 = vld [vmem:[%s2288_s1 + $0x48] sm:$0x1]  ;;  %v612_v17 = vsel %vm28_vm3, %v1023_v60, %v604_v29  ;;  %v735_v60 = vsel %vm13_vm0, %v1218_v22, %v1375_v12  ;;  %v765_v63 = vsel %vm25_vm5, %v1147_v5, %v757_v59 }
  0x3a   :  { %v668_v35 = vsel %vm18_vm11, %v1041_v23, %v660_v30  ;;  %v1057_v37 = vld [vmem:[%s2288_s1 + $0x58] sm:$0x1]  ;;  %v1035_v39 = vld [vmem:[%s2288_s1 + $0xe8] sm:$0x1]  ;;  %v635_v40 = vsel %vm30_vm4, %v1027_v61, %v612_v17  ;;  %v743_v12 = vsel %vm15_vm1, %v1232_v25, %v735_v60  ;;  %v773_v9 = vsel %vm27_vm6, %v1152_v6, %v765_v63 }
  0x3b   :  { %v1039_v1 = vld [vmem:[%s2288_s1 + $0xf8] sm:$0x1]  ;;  %v676_v41 = vsel %vm1242_vm15, %v1045_v24, %v668_v35  ;;  %v658_v46 = vld [vmem:[%s2288_s1 + $0x88] sm:$0x1]  ;;  %1031 = vst [vmem:[%s2289_s2 + $0xd8] sm:$0x1] %v635_v40  ;;  %v751_v14 = vsel %vm17_vm2, %v1271_v36, %v743_v12  ;;  %v796_v6 = vsel %vm29_vm7, %v1207_v20, %v773_v9 }
  0x3c   :  { %v654_v45 = vsel %vm14_vm9, %v1039_v1, %v1035_v39  ;;  %v1043_v2 = vld [vmem:[%s2288_s1 + $0x98] sm:$0x1]  ;;  %v1047_v49 = vld [vmem:[%s2288_s1 + $0xa8] sm:$0x1]  ;;  %v684_v50 = vsel %vm26_vm14, %v1049_v31, %v676_v41  ;;  %v759_v36 = vsel %vm1154_vm8, %v1290_v42, %v751_v14  ;;  %1092 = vst [vmem:[%s2289_s2 + $0x70] sm:$0xff] %v796_v6 }
  0x3d   :  { %v662_v52 = vsel %vm16_vm10, %v658_v46, %v654_v45  ;;  %v1051_v53 = vld [vmem:[%s2288_s1 + $0xb8] sm:$0x1]  ;;  %v1055_v54 = vld [vmem:[%s2288_s1 + $0xc8] sm:$0x1]  ;;  %v692_v56 = vsel %vm28_vm3, %v1053_v32, %v684_v50  ;;  %v767_v24 = vsel %vm25_vm5, %v1295_v43, %v759_v36 }
  0x3e   :  { %v670_v57 = vsel %vm18_vm11, %v1043_v2, %v662_v52  ;;  %v1059_v58 = vld [vmem:[%s2288_s1 + $0xd8] sm:$0x1]  ;;  %v715_v61 = vsel %vm30_vm4, %v1057_v37, %v692_v56  ;;  %v730_v4 = vld [vmem:[%s2288_s1 + $0x8] sm:$0x1]  ;;  %v775_v29 = vsel %vm27_vm6, %v1311_v47, %v767_v24 }
  0x3f   :  { %v1065_v3 = vld [vmem:[%s2288_s1 + $0x78] sm:$0x1]  ;;  %v678_v62 = vsel %vm1242_vm15, %v1047_v49, %v670_v57  ;;  %v1073_v22 = vld [vmem:[%s2288_s1 + $0x28] sm:$0x1]  ;;  %1061 = vst [vmem:[%s2289_s2 + $0x68] sm:$0x1] %v715_v61  ;;  %v798_v33 = vsel %vm29_vm7, %v1316_v48, %v775_v29 }
  0x40   :  { %v1069_v8 = vld [vmem:[%s2288_s1 + $0x18] sm:$0x1]  ;;  %v686_v5 = vsel %vm26_vm14, %v1051_v53, %v678_v62  ;;  %v734_v10 = vsel %vm14_vm9, %v730_v4, %v1065_v3  ;;  %v1081_v25 = vld [vmem:[%s2288_s1 + $0x48] sm:$0x1]  ;;  %1094 = vst [vmem:[%s2289_s2 + $0xf0] sm:$0xff] %v798_v33 }
  0x41   :  { %v1077_v11 = vld [vmem:[%s2288_s1 + $0x38] sm:$0x1]  ;;  %v694_v15 = vsel %vm28_vm3, %v1055_v54, %v686_v5  ;;  %v742_v16 = vsel %vm16_vm10, %v1069_v8, %v734_v10  ;;  %v1089_v19 = vld [vmem:[%s2288_s1 + $0x68] sm:$0x1] }
  0x42   :  { %v1085_v18 = vld [vmem:[%s2288_s1 + $0x58] sm:$0x1]  ;;  %v717_v20 = vsel %vm30_vm4, %v1059_v58, %v694_v15  ;;  %v750_v23 = vsel %vm18_vm11, %v1073_v22, %v742_v16  ;;  %v732_v7 = vld [vmem:[%s2288_s1 + $0x88] sm:$0x1] }
  0x43   :  { %v1067_v21 = vld [vmem:[%s2288_s1 + $0xf8] sm:$0x1]  ;;  %1063 = vst [vmem:[%s2289_s2 + $0xe8] sm:$0x1] %v717_v20  ;;  %v758_v26 = vsel %vm1242_vm15, %v1077_v11, %v750_v23  ;;  %v1075_v30 = vld [vmem:[%s2288_s1 + $0xa8] sm:$0x1] }
  0x44   :  { %v1071_v42 = vld [vmem:[%s2288_s1 + $0x98] sm:$0x1]  ;;  %v736_v43 = vsel %vm14_vm9, %v732_v7, %v1067_v21  ;;  %v766_v32 = vsel %vm26_vm14, %v1081_v25, %v758_v26  ;;  %v1083_v34 = vld [vmem:[%s2288_s1 + $0xc8] sm:$0x1] }
  0x45   :  { %v1079_v31 = vld [vmem:[%s2288_s1 + $0xb8] sm:$0x1]  ;;  %v744_v47 = vsel %vm16_vm10, %v1071_v42, %v736_v43  ;;  %v774_v17 = vsel %vm28_vm3, %v1085_v18, %v766_v32  ;;  %v1091_v38 = vld [vmem:[%s2288_s1 + $0xe8] sm:$0x1] }
  0x46   :  { %v752_v35 = vsel %vm18_vm11, %v1075_v30, %v744_v47  ;;  %v1087_v0 = vld [vmem:[%s2288_s1 + $0xd8] sm:$0x1]  ;;  %v797_v48 = vsel %vm30_vm4, %v1089_v19, %v774_v17 }
  0x47   :  { %v760_v37 = vsel %vm1242_vm15, %v1079_v31, %v752_v35  ;;  %1093 = vst [vmem:[%s2289_s2 + $0x78] sm:$0x1] %v797_v48 }
  0x48   :  { %v768_v39 = vsel %vm26_vm14, %v1083_v34, %v760_v37 }
  0x49   :  { %v776_v1 = vsel %vm28_vm3, %v1087_v0, %v768_v39 }
  0x4a   :  { %v799_v27 = vsel %vm30_vm4, %v1091_v38, %v776_v1 }
  0x4b   :  { %1095 = vst [vmem:[%s2289_s2 + $0xf8] sm:$0x1] %v799_v27 }

</bundles_post_ra>
